<compile_context>
chip_gen: v6e
topology: v6e:2x2x1
jax: 0.10.0
libtpu: 0.0.40
codegen_flags: <defaults>
</compile_context>

<pallas_src>
import math
import functools

import jax
import jax.numpy as jnp
from jax import lax
from jax.experimental import pallas as pl
from jax.experimental.pallas import tpu as pltpu


_INV_SQRT2 = 1.0 / math.sqrt(2.0)


def _erf_approx(x):
    # Abramowitz & Stegun 7.1.26 polynomial, |abs error| <= 1.5e-7.
    p = 0.3275911
    a1, a2, a3, a4, a5 = (0.254829592, -0.284496736, 1.421413741,
                          -1.453152027, 1.061405429)
    ax = jnp.abs(x)
    t = 1.0 / (1.0 + p * ax)
    poly = t * (a1 + t * (a2 + t * (a3 + t * (a4 + t * a5))))
    y = 1.0 - poly * jnp.exp(-ax * ax)
    return jnp.where(x >= 0.0, y, -y)


def _gelu_exact(x):
    # PyTorch nn.GELU() default = exact erf formulation.
    return 0.5 * x * (1.0 + _erf_approx(x * _INV_SQRT2))


def _conv3x3_taps(src, w_ref, b_ref, jh, jw, *, C, H, W):
    """3x3 'same' conv as 9 per-tap MXU matmuls accumulated in f32.

    src   : (C, N) activations, N = images_per_step * H * W (lane-dense).
    w_ref : (9, C, C) tap-major packed weights (tap t = kh*3 + kw).
    b_ref : (C, 1) bias.
    jh/jw : (1, N) int32 per-lane row / col index inside its own image.
    """
    N = src.shape[-1]
    # Bias folded into the accumulator init (single hoisted lane-broadcast).
    acc = jnp.broadcast_to(b_ref[...], (C, N))
    for kh in range(3):
        for kw in range(3):
            t = kh * 3 + kw
            dh, dw = kh - 1, kw - 1
            off = dh * W + dw                       # flat-spatial source offset
            if off == 0:
                tap = src                           # center tap: no shift/mask
            else:
                shifted = pltpu.roll(src, shift=(-off) % N, axis=1)
                valid = ((jh + dh >= 0) & (jh + dh < H) &
                         (jw + dw >= 0) & (jw + dw < W))
                maskf = jnp.where(valid, 1.0, 0.0)  # (1, N) f32
                tap = shifted * maskf               # emulates zero padding=1
            # Per-tap matmul accumulated straight into one accumulator
            # (no (9C, N) im2col, no concatenates).
            acc = acc + jnp.dot(w_ref[t], tap,
                                preferred_element_type=jnp.float32)
    return acc


def _dfe_kernel(rowcol_ref, x_ref, w1_ref, b1_ref, w2_ref, b2_ref, o_ref,
                *, C, H, W):
    jh = rowcol_ref[0:1, :]
    jw = rowcol_ref[1:2, :]
    # conv1 -> conv2 -> GELU -> residual.  x_ref is re-read for the residual
    # instead of keeping the loaded value live across both convs.
    y1 = _conv3x3_taps(x_ref[...], w1_ref, b1_ref, jh, jw, C=C, H=H, W=W)
    y2 = _conv3x3_taps(y1, w2_ref, b2_ref, jh, jw, C=C, H=H, W=W)
    o_ref[...] = (_gelu_exact(y2) + x_ref[...]).astype(o_ref.dtype)


def _pick_images_per_step(batch, C, HW, budget_bytes=8 << 20):
    """Images folded into one grid step, bounded by a VMEM activation budget."""
    per_image = 6 * C * HW * 4          # x, y1, y2, tap, out (+slack) per image
    nb = max(1, min(batch, budget_bytes // max(per_image, 1)))
    while nb > 1 and (batch % nb != 0 or (nb * HW) % 128 != 0):
        nb -= 1
    if nb < batch and (nb * HW) % 128 != 0:
        nb = batch                      # single block == full array (exempt)
    return int(nb)


def dfe_block(x_nchw, w1, b1, w2, b2):
    """x_nchw: (B, C, H, W) f32; w*: (C, C, 3, 3) f32 (OIHW); b*: (C,) f32."""
    B, C, H, W = x_nchw.shape
    HW = H * W
    N_total = B * HW

    # Fold batch into the lane dimension: channels in sublanes, (b,h,w) in lanes.
    x_cn = jnp.transpose(x_nchw.astype(jnp.float32), (1, 0, 2, 3)).reshape(C, N_total)

    # Tap-major weight packing: (9, Cout, Cin); tap t = kh*3 + kw.
    w1_t = jnp.transpose(w1.astype(jnp.float32), (2, 3, 0, 1)).reshape(9, C, C)
    w2_t = jnp.transpose(w2.astype(jnp.float32), (2, 3, 0, 1)).reshape(9, C, C)
    b1_c = b1.reshape(C, 1).astype(jnp.float32)
    b2_c = b2.reshape(C, 1).astype(jnp.float32)

    # Compact per-lane row/col indices; per-tap masks are two compares in-kernel.
    idx = jnp.arange(N_total, dtype=jnp.int32)
    rowcol = jnp.stack([(idx % HW) // W, idx % W], axis=0)   # (2, B*HW) int32

    nb = _pick_images_per_step(B, C, HW)
    ln = nb * HW
    num_blocks = N_total // ln

    kernel = functools.partial(_dfe_kernel, C=C, H=H, W=W)

    # VMEM budget from the actual per-step footprint (with headroom).
    act = C * ln * 4
    est = (4 * act + 4 * act            # x / out blocks, double-buffered
           + 3 * act                    # y1 / y2 / shifted-tap values
           + 4 * 9 * C * C * 4          # w1 + w2, double-buffered
           + 4 * 2 * ln * 4             # rowcol, double-buffered
           + 4 * C * 4)                 # biases
    vmem_limit = int(min(max(2 * est, 32 * 1024 * 1024), 64 * 1024 * 1024))

    flops = 2 * (2 * C * (9 * C) * N_total)            # two convs, 2*M*K*N
    bytes_accessed = (2 * C * N_total + 2 * 9 * C * C + 2 * C + 2 * N_total) * 4

    out_cn = pl.pallas_call(
        kernel,
        out_shape=jax.ShapeDtypeStruct((C, N_total), jnp.float32),
        grid_spec=pltpu.PrefetchScalarGridSpec(
            num_scalar_prefetch=0,
            grid=(num_blocks,),
            in_specs=[
                pl.BlockSpec((2, ln), lambda i: (0, i)),
                pl.BlockSpec((C, ln), lambda i: (0, i)),
                pl.BlockSpec((9, C, C), lambda i: (0, 0, 0)),
                pl.BlockSpec((C, 1), lambda i: (0, 0)),
                pl.BlockSpec((9, C, C), lambda i: (0, 0, 0)),
                pl.BlockSpec((C, 1), lambda i: (0, 0)),
            ],
            out_specs=pl.BlockSpec((C, ln), lambda i: (0, i)),
        ),
        compiler_params=pltpu.CompilerParams(
            dimension_semantics=("parallel",),
            vmem_limit_bytes=vmem_limit),
        cost_estimate=pl.CostEstimate(
            flops=flops,
            transcendentals=C * N_total,
            bytes_accessed=bytes_accessed),
    )(rowcol, x_cn, w1_t, b1_c, w2_t, b2_c)

    # Un-fold: (C, B*HW) -> (B, C, H, W).
    return jnp.transpose(out_cn.reshape(C, B, H, W), (1, 0, 2, 3))


def _reference(x_nchw, w1, b1, w2, b2):
    """Pure-JAX reference (matches PyTorch DFEBlock.forward)."""
    dn = lax.conv_dimension_numbers(x_nchw.shape, w1.shape,
                                    ("NCHW", "OIHW", "NCHW"))
    y = lax.conv_general_dilated(x_nchw, w1, (1, 1), ((1, 1), (1, 1)),
                                 dimension_numbers=dn,
                                 precision=lax.Precision.HIGHEST)
    y = y + b1.reshape(1, -1, 1, 1)
    y = lax.conv_general_dilated(y, w2, (1, 1), ((1, 1), (1, 1)),
                                 dimension_numbers=dn,
                                 precision=lax.Precision.HIGHEST)
    y = y + b2.reshape(1, -1, 1, 1)
    y = jax.nn.gelu(y, approximate=False)
    return y + x_nchw


if __name__ == "__main__":
    B, C, H, W = 2, 8, 16, 16

    key = jax.random.PRNGKey(0)
    kx, k1, k2, k3, k4 = jax.random.split(key, 5)

    # Deterministic synthetic parameters (nn.Conv2d(C, C, 3, padding=1) shapes).
    x = jax.random.normal(kx, (B, C, H, W), dtype=jnp.float32)
    fan_in = C * 3 * 3
    scale = 1.0 / math.sqrt(fan_in)
    w1 = jax.random.uniform(k1, (C, C, 3, 3), jnp.float32, -scale, scale)
    b1 = jax.random.uniform(k2, (C,), jnp.float32, -scale, scale)
    w2 = jax.random.uniform(k3, (C, C, 3, 3), jnp.float32, -scale, scale)
    b2 = jax.random.uniform(k4, (C,), jnp.float32, -scale, scale)

    out = jax.block_until_ready(dfe_block(x, w1, b1, w2, b2))
    ref = jax.block_until_ready(_reference(x, w1, b1, w2, b2))

    assert out.shape == (B, C, H, W)
    assert jnp.allclose(out, ref, rtol=1e-4, atol=1e-4), "mismatch vs reference"

    print("KERNEL_OK")
</pallas_src>

<mosaic_0001>
module attributes {stable_mosaic.version = 11 : i64} {
  func.func @_dfe_kernel(%arg0: i32, %arg1: memref<2x512xi32, #tpu.memory_space<vmem>>, %arg2: memref<8x512xf32, #tpu.memory_space<vmem>>, %arg3: memref<9x8x8xf32, #tpu.memory_space<vmem>>, %arg4: memref<8x1xf32, #tpu.memory_space<vmem>>, %arg5: memref<9x8x8xf32, #tpu.memory_space<vmem>>, %arg6: memref<8x1xf32, #tpu.memory_space<vmem>>, %arg7: memref<8x512xf32, #tpu.memory_space<vmem>>) attributes {dimension_semantics = [#tpu.dimension_semantics<parallel>], iteration_bounds = array<i64: 1>, scalar_prefetch = 0 : i64, scratch_operands = 0 : i64, tpu.core_type = #tpu.core_type<tc>, window_params = [{transform_indices = @transform_0, window_bounds = array<i64: 2, 512>}, {transform_indices = @transform_1, window_bounds = array<i64: 8, 512>}, {pipeline_mode = #tpu.pipeline_mode<synchronous>, transform_indices = @transform_2, window_bounds = array<i64: 9, 8, 8>}, {pipeline_mode = #tpu.pipeline_mode<synchronous>, transform_indices = @transform_3, window_bounds = array<i64: 8, 1>}, {pipeline_mode = #tpu.pipeline_mode<synchronous>, transform_indices = @transform_4, window_bounds = array<i64: 9, 8, 8>}, {pipeline_mode = #tpu.pipeline_mode<synchronous>, transform_indices = @transform_5, window_bounds = array<i64: 8, 1>}, {transform_indices = @transform_6, window_bounds = array<i64: 8, 512>}]} {
    %c0 = arith.constant 0 : index
    %c0_0 = arith.constant 0 : index
    %0 = vector.load %arg1[%c0, %c0_0] : memref<2x512xi32, #tpu.memory_space<vmem>>, vector<1x512xi32>
    %c1 = arith.constant 1 : index
    %c0_1 = arith.constant 0 : index
    %1 = vector.load %arg1[%c1, %c0_1] : memref<2x512xi32, #tpu.memory_space<vmem>>, vector<1x512xi32>
    %c0_2 = arith.constant 0 : index
    %c0_3 = arith.constant 0 : index
    %2 = vector.load %arg2[%c0_2, %c0_3] : memref<8x512xf32, #tpu.memory_space<vmem>>, vector<8x512xf32>
    %c0_4 = arith.constant 0 : index
    %c0_5 = arith.constant 0 : index
    %3 = vector.load %arg4[%c0_4, %c0_5] : memref<8x1xf32, #tpu.memory_space<vmem>>, vector<8x1xf32>
    %4 = vector.shape_cast %3 : vector<8x1xf32> to vector<8x1xf32>
    %5 = vector.broadcast %4 : vector<8x1xf32> to vector<8x512xf32>
    %c17_i32 = arith.constant 17 : i32
    %6 = tpu.dynamic_rotate %2 by %c17_i32 dim 1 : vector<8x512xf32>, i32 -> vector<8x512xf32>
    %c-1_i32 = arith.constant -1 : i32
    %7 = vector.broadcast %c-1_i32 : i32 to vector<1x512xi32>
    %8 = arith.addi %0, %7 : vector<1x512xi32>
    %c0_i32 = arith.constant 0 : i32
    %9 = vector.broadcast %c0_i32 : i32 to vector<1x512xi32>
    %10 = arith.cmpi sge, %8, %9 : vector<1x512xi32>
    %c-1_i32_6 = arith.constant -1 : i32
    %11 = vector.broadcast %c-1_i32_6 : i32 to vector<1x512xi32>
    %12 = arith.addi %0, %11 : vector<1x512xi32>
    %c16_i32 = arith.constant 16 : i32
    %13 = vector.broadcast %c16_i32 : i32 to vector<1x512xi32>
    %14 = arith.cmpi slt, %12, %13 : vector<1x512xi32>
    %15 = arith.andi %10, %14 : vector<1x512xi1>
    %c-1_i32_7 = arith.constant -1 : i32
    %16 = vector.broadcast %c-1_i32_7 : i32 to vector<1x512xi32>
    %17 = arith.addi %1, %16 : vector<1x512xi32>
    %c0_i32_8 = arith.constant 0 : i32
    %18 = vector.broadcast %c0_i32_8 : i32 to vector<1x512xi32>
    %19 = arith.cmpi sge, %17, %18 : vector<1x512xi32>
    %20 = arith.andi %15, %19 : vector<1x512xi1>
    %c-1_i32_9 = arith.constant -1 : i32
    %21 = vector.broadcast %c-1_i32_9 : i32 to vector<1x512xi32>
    %22 = arith.addi %1, %21 : vector<1x512xi32>
    %c16_i32_10 = arith.constant 16 : i32
    %23 = vector.broadcast %c16_i32_10 : i32 to vector<1x512xi32>
    %24 = arith.cmpi slt, %22, %23 : vector<1x512xi32>
    %25 = arith.andi %20, %24 : vector<1x512xi1>
    %cst = arith.constant 1.000000e+00 : f32
    %cst_11 = arith.constant 0.000000e+00 : f32
    %26 = vector.broadcast %cst : f32 to vector<1x512xf32>
    %27 = vector.broadcast %cst_11 : f32 to vector<1x512xf32>
    %28 = arith.select %25, %26, %27 : vector<1x512xi1>, vector<1x512xf32>
    %29 = vector.broadcast %28 : vector<1x512xf32> to vector<8x512xf32>
    %30 = arith.mulf %6, %29 : vector<8x512xf32>
    %c0_12 = arith.constant 0 : index
    %c0_13 = arith.constant 0 : index
    %c0_14 = arith.constant 0 : index
    %31 = vector.load %arg3[%c0_12, %c0_13, %c0_14] : memref<9x8x8xf32, #tpu.memory_space<vmem>>, vector<1x8x8xf32>
    %32 = vector.shape_cast %31 : vector<1x8x8xf32> to vector<8x8xf32>
    %cst_15 = arith.constant dense<0.000000e+00> : vector<8x512xf32>
    %33 = tpu.matmul %32, %30, %cst_15 {dimension_numbers = #tpu.dot_dimension_numbers<[1], [0], [0], [1], [0, 0, 1, 1], [], []>} : vector<8x8xf32>, vector<8x512xf32>, vector<8x512xf32> -> vector<8x512xf32>
    %34 = arith.addf %5, %33 : vector<8x512xf32>
    %c16_i32_16 = arith.constant 16 : i32
    %35 = tpu.dynamic_rotate %2 by %c16_i32_16 dim 1 : vector<8x512xf32>, i32 -> vector<8x512xf32>
    %c-1_i32_17 = arith.constant -1 : i32
    %36 = vector.broadcast %c-1_i32_17 : i32 to vector<1x512xi32>
    %37 = arith.addi %0, %36 : vector<1x512xi32>
    %c0_i32_18 = arith.constant 0 : i32
    %38 = vector.broadcast %c0_i32_18 : i32 to vector<1x512xi32>
    %39 = arith.cmpi sge, %37, %38 : vector<1x512xi32>
    %c-1_i32_19 = arith.constant -1 : i32
    %40 = vector.broadcast %c-1_i32_19 : i32 to vector<1x512xi32>
    %41 = arith.addi %0, %40 : vector<1x512xi32>
    %c16_i32_20 = arith.constant 16 : i32
    %42 = vector.broadcast %c16_i32_20 : i32 to vector<1x512xi32>
    %43 = arith.cmpi slt, %41, %42 : vector<1x512xi32>
    %44 = arith.andi %39, %43 : vector<1x512xi1>
    %c0_i32_21 = arith.constant 0 : i32
    %45 = vector.broadcast %c0_i32_21 : i32 to vector<1x512xi32>
    %46 = arith.addi %1, %45 : vector<1x512xi32>
    %c0_i32_22 = arith.constant 0 : i32
    %47 = vector.broadcast %c0_i32_22 : i32 to vector<1x512xi32>
    %48 = arith.cmpi sge, %46, %47 : vector<1x512xi32>
    %49 = arith.andi %44, %48 : vector<1x512xi1>
    %c0_i32_23 = arith.constant 0 : i32
    %50 = vector.broadcast %c0_i32_23 : i32 to vector<1x512xi32>
    %51 = arith.addi %1, %50 : vector<1x512xi32>
    %c16_i32_24 = arith.constant 16 : i32
    %52 = vector.broadcast %c16_i32_24 : i32 to vector<1x512xi32>
    %53 = arith.cmpi slt, %51, %52 : vector<1x512xi32>
    %54 = arith.andi %49, %53 : vector<1x512xi1>
    %cst_25 = arith.constant 1.000000e+00 : f32
    %cst_26 = arith.constant 0.000000e+00 : f32
    %55 = vector.broadcast %cst_25 : f32 to vector<1x512xf32>
    %56 = vector.broadcast %cst_26 : f32 to vector<1x512xf32>
    %57 = arith.select %54, %55, %56 : vector<1x512xi1>, vector<1x512xf32>
    %58 = vector.broadcast %57 : vector<1x512xf32> to vector<8x512xf32>
    %59 = arith.mulf %35, %58 : vector<8x512xf32>
    %c1_27 = arith.constant 1 : index
    %c0_28 = arith.constant 0 : index
    %c0_29 = arith.constant 0 : index
    %60 = vector.load %arg3[%c1_27, %c0_28, %c0_29] : memref<9x8x8xf32, #tpu.memory_space<vmem>>, vector<1x8x8xf32>
    %61 = vector.shape_cast %60 : vector<1x8x8xf32> to vector<8x8xf32>
    %cst_30 = arith.constant dense<0.000000e+00> : vector<8x512xf32>
    %62 = tpu.matmul %61, %59, %cst_30 {dimension_numbers = #tpu.dot_dimension_numbers<[1], [0], [0], [1], [0, 0, 1, 1], [], []>} : vector<8x8xf32>, vector<8x512xf32>, vector<8x512xf32> -> vector<8x512xf32>
    %63 = arith.addf %34, %62 : vector<8x512xf32>
    %c15_i32 = arith.constant 15 : i32
    %64 = tpu.dynamic_rotate %2 by %c15_i32 dim 1 : vector<8x512xf32>, i32 -> vector<8x512xf32>
    %c-1_i32_31 = arith.constant -1 : i32
    %65 = vector.broadcast %c-1_i32_31 : i32 to vector<1x512xi32>
    %66 = arith.addi %0, %65 : vector<1x512xi32>
    %c0_i32_32 = arith.constant 0 : i32
    %67 = vector.broadcast %c0_i32_32 : i32 to vector<1x512xi32>
    %68 = arith.cmpi sge, %66, %67 : vector<1x512xi32>
    %c-1_i32_33 = arith.constant -1 : i32
    %69 = vector.broadcast %c-1_i32_33 : i32 to vector<1x512xi32>
    %70 = arith.addi %0, %69 : vector<1x512xi32>
    %c16_i32_34 = arith.constant 16 : i32
    %71 = vector.broadcast %c16_i32_34 : i32 to vector<1x512xi32>
    %72 = arith.cmpi slt, %70, %71 : vector<1x512xi32>
    %73 = arith.andi %68, %72 : vector<1x512xi1>
    %c1_i32 = arith.constant 1 : i32
    %74 = vector.broadcast %c1_i32 : i32 to vector<1x512xi32>
    %75 = arith.addi %1, %74 : vector<1x512xi32>
    %c0_i32_35 = arith.constant 0 : i32
    %76 = vector.broadcast %c0_i32_35 : i32 to vector<1x512xi32>
    %77 = arith.cmpi sge, %75, %76 : vector<1x512xi32>
    %78 = arith.andi %73, %77 : vector<1x512xi1>
    %c1_i32_36 = arith.constant 1 : i32
    %79 = vector.broadcast %c1_i32_36 : i32 to vector<1x512xi32>
    %80 = arith.addi %1, %79 : vector<1x512xi32>
    %c16_i32_37 = arith.constant 16 : i32
    %81 = vector.broadcast %c16_i32_37 : i32 to vector<1x512xi32>
    %82 = arith.cmpi slt, %80, %81 : vector<1x512xi32>
    %83 = arith.andi %78, %82 : vector<1x512xi1>
    %cst_38 = arith.constant 1.000000e+00 : f32
    %cst_39 = arith.constant 0.000000e+00 : f32
    %84 = vector.broadcast %cst_38 : f32 to vector<1x512xf32>
    %85 = vector.broadcast %cst_39 : f32 to vector<1x512xf32>
    %86 = arith.select %83, %84, %85 : vector<1x512xi1>, vector<1x512xf32>
    %87 = vector.broadcast %86 : vector<1x512xf32> to vector<8x512xf32>
    %88 = arith.mulf %64, %87 : vector<8x512xf32>
    %c2 = arith.constant 2 : index
    %c0_40 = arith.constant 0 : index
    %c0_41 = arith.constant 0 : index
    %89 = vector.load %arg3[%c2, %c0_40, %c0_41] : memref<9x8x8xf32, #tpu.memory_space<vmem>>, vector<1x8x8xf32>
    %90 = vector.shape_cast %89 : vector<1x8x8xf32> to vector<8x8xf32>
    %cst_42 = arith.constant dense<0.000000e+00> : vector<8x512xf32>
    %91 = tpu.matmul %90, %88, %cst_42 {dimension_numbers = #tpu.dot_dimension_numbers<[1], [0], [0], [1], [0, 0, 1, 1], [], []>} : vector<8x8xf32>, vector<8x512xf32>, vector<8x512xf32> -> vector<8x512xf32>
    %92 = arith.addf %63, %91 : vector<8x512xf32>
    %c1_i32_43 = arith.constant 1 : i32
    %93 = tpu.dynamic_rotate %2 by %c1_i32_43 dim 1 : vector<8x512xf32>, i32 -> vector<8x512xf32>
    %c0_i32_44 = arith.constant 0 : i32
    %94 = vector.broadcast %c0_i32_44 : i32 to vector<1x512xi32>
    %95 = arith.addi %0, %94 : vector<1x512xi32>
    %c0_i32_45 = arith.constant 0 : i32
    %96 = vector.broadcast %c0_i32_45 : i32 to vector<1x512xi32>
    %97 = arith.cmpi sge, %95, %96 : vector<1x512xi32>
    %c0_i32_46 = arith.constant 0 : i32
    %98 = vector.broadcast %c0_i32_46 : i32 to vector<1x512xi32>
    %99 = arith.addi %0, %98 : vector<1x512xi32>
    %c16_i32_47 = arith.constant 16 : i32
    %100 = vector.broadcast %c16_i32_47 : i32 to vector<1x512xi32>
    %101 = arith.cmpi slt, %99, %100 : vector<1x512xi32>
    %102 = arith.andi %97, %101 : vector<1x512xi1>
    %c-1_i32_48 = arith.constant -1 : i32
    %103 = vector.broadcast %c-1_i32_48 : i32 to vector<1x512xi32>
    %104 = arith.addi %1, %103 : vector<1x512xi32>
    %c0_i32_49 = arith.constant 0 : i32
    %105 = vector.broadcast %c0_i32_49 : i32 to vector<1x512xi32>
    %106 = arith.cmpi sge, %104, %105 : vector<1x512xi32>
    %107 = arith.andi %102, %106 : vector<1x512xi1>
    %c-1_i32_50 = arith.constant -1 : i32
    %108 = vector.broadcast %c-1_i32_50 : i32 to vector<1x512xi32>
    %109 = arith.addi %1, %108 : vector<1x512xi32>
    %c16_i32_51 = arith.constant 16 : i32
    %110 = vector.broadcast %c16_i32_51 : i32 to vector<1x512xi32>
    %111 = arith.cmpi slt, %109, %110 : vector<1x512xi32>
    %112 = arith.andi %107, %111 : vector<1x512xi1>
    %cst_52 = arith.constant 1.000000e+00 : f32
    %cst_53 = arith.constant 0.000000e+00 : f32
    %113 = vector.broadcast %cst_52 : f32 to vector<1x512xf32>
    %114 = vector.broadcast %cst_53 : f32 to vector<1x512xf32>
    %115 = arith.select %112, %113, %114 : vector<1x512xi1>, vector<1x512xf32>
    %116 = vector.broadcast %115 : vector<1x512xf32> to vector<8x512xf32>
    %117 = arith.mulf %93, %116 : vector<8x512xf32>
    %c3 = arith.constant 3 : index
    %c0_54 = arith.constant 0 : index
    %c0_55 = arith.constant 0 : index
    %118 = vector.load %arg3[%c3, %c0_54, %c0_55] : memref<9x8x8xf32, #tpu.memory_space<vmem>>, vector<1x8x8xf32>
    %119 = vector.shape_cast %118 : vector<1x8x8xf32> to vector<8x8xf32>
    %cst_56 = arith.constant dense<0.000000e+00> : vector<8x512xf32>
    %120 = tpu.matmul %119, %117, %cst_56 {dimension_numbers = #tpu.dot_dimension_numbers<[1], [0], [0], [1], [0, 0, 1, 1], [], []>} : vector<8x8xf32>, vector<8x512xf32>, vector<8x512xf32> -> vector<8x512xf32>
    %121 = arith.addf %92, %120 : vector<8x512xf32>
    %c4 = arith.constant 4 : index
    %c0_57 = arith.constant 0 : index
    %c0_58 = arith.constant 0 : index
    %122 = vector.load %arg3[%c4, %c0_57, %c0_58] : memref<9x8x8xf32, #tpu.memory_space<vmem>>, vector<1x8x8xf32>
    %123 = vector.shape_cast %122 : vector<1x8x8xf32> to vector<8x8xf32>
    %cst_59 = arith.constant dense<0.000000e+00> : vector<8x512xf32>
    %124 = tpu.matmul %123, %2, %cst_59 {dimension_numbers = #tpu.dot_dimension_numbers<[1], [0], [0], [1], [0, 0, 1, 1], [], []>} : vector<8x8xf32>, vector<8x512xf32>, vector<8x512xf32> -> vector<8x512xf32>
    %125 = arith.addf %121, %124 : vector<8x512xf32>
    %c511_i32 = arith.constant 511 : i32
    %126 = tpu.dynamic_rotate %2 by %c511_i32 dim 1 : vector<8x512xf32>, i32 -> vector<8x512xf32>
    %c0_i32_60 = arith.constant 0 : i32
    %127 = vector.broadcast %c0_i32_60 : i32 to vector<1x512xi32>
    %128 = arith.addi %0, %127 : vector<1x512xi32>
    %c0_i32_61 = arith.constant 0 : i32
    %129 = vector.broadcast %c0_i32_61 : i32 to vector<1x512xi32>
    %130 = arith.cmpi sge, %128, %129 : vector<1x512xi32>
    %c0_i32_62 = arith.constant 0 : i32
    %131 = vector.broadcast %c0_i32_62 : i32 to vector<1x512xi32>
    %132 = arith.addi %0, %131 : vector<1x512xi32>
    %c16_i32_63 = arith.constant 16 : i32
    %133 = vector.broadcast %c16_i32_63 : i32 to vector<1x512xi32>
    %134 = arith.cmpi slt, %132, %133 : vector<1x512xi32>
    %135 = arith.andi %130, %134 : vector<1x512xi1>
    %c1_i32_64 = arith.constant 1 : i32
    %136 = vector.broadcast %c1_i32_64 : i32 to vector<1x512xi32>
    %137 = arith.addi %1, %136 : vector<1x512xi32>
    %c0_i32_65 = arith.constant 0 : i32
    %138 = vector.broadcast %c0_i32_65 : i32 to vector<1x512xi32>
    %139 = arith.cmpi sge, %137, %138 : vector<1x512xi32>
    %140 = arith.andi %135, %139 : vector<1x512xi1>
    %c1_i32_66 = arith.constant 1 : i32
    %141 = vector.broadcast %c1_i32_66 : i32 to vector<1x512xi32>
    %142 = arith.addi %1, %141 : vector<1x512xi32>
    %c16_i32_67 = arith.constant 16 : i32
    %143 = vector.broadcast %c16_i32_67 : i32 to vector<1x512xi32>
    %144 = arith.cmpi slt, %142, %143 : vector<1x512xi32>
    %145 = arith.andi %140, %144 : vector<1x512xi1>
    %cst_68 = arith.constant 1.000000e+00 : f32
    %cst_69 = arith.constant 0.000000e+00 : f32
    %146 = vector.broadcast %cst_68 : f32 to vector<1x512xf32>
    %147 = vector.broadcast %cst_69 : f32 to vector<1x512xf32>
    %148 = arith.select %145, %146, %147 : vector<1x512xi1>, vector<1x512xf32>
    %149 = vector.broadcast %148 : vector<1x512xf32> to vector<8x512xf32>
    %150 = arith.mulf %126, %149 : vector<8x512xf32>
    %c5 = arith.constant 5 : index
    %c0_70 = arith.constant 0 : index
    %c0_71 = arith.constant 0 : index
    %151 = vector.load %arg3[%c5, %c0_70, %c0_71] : memref<9x8x8xf32, #tpu.memory_space<vmem>>, vector<1x8x8xf32>
    %152 = vector.shape_cast %151 : vector<1x8x8xf32> to vector<8x8xf32>
    %cst_72 = arith.constant dense<0.000000e+00> : vector<8x512xf32>
    %153 = tpu.matmul %152, %150, %cst_72 {dimension_numbers = #tpu.dot_dimension_numbers<[1], [0], [0], [1], [0, 0, 1, 1], [], []>} : vector<8x8xf32>, vector<8x512xf32>, vector<8x512xf32> -> vector<8x512xf32>
    %154 = arith.addf %125, %153 : vector<8x512xf32>
    %c497_i32 = arith.constant 497 : i32
    %155 = tpu.dynamic_rotate %2 by %c497_i32 dim 1 : vector<8x512xf32>, i32 -> vector<8x512xf32>
    %c1_i32_73 = arith.constant 1 : i32
    %156 = vector.broadcast %c1_i32_73 : i32 to vector<1x512xi32>
    %157 = arith.addi %0, %156 : vector<1x512xi32>
    %c0_i32_74 = arith.constant 0 : i32
    %158 = vector.broadcast %c0_i32_74 : i32 to vector<1x512xi32>
    %159 = arith.cmpi sge, %157, %158 : vector<1x512xi32>
    %c1_i32_75 = arith.constant 1 : i32
    %160 = vector.broadcast %c1_i32_75 : i32 to vector<1x512xi32>
    %161 = arith.addi %0, %160 : vector<1x512xi32>
    %c16_i32_76 = arith.constant 16 : i32
    %162 = vector.broadcast %c16_i32_76 : i32 to vector<1x512xi32>
    %163 = arith.cmpi slt, %161, %162 : vector<1x512xi32>
    %164 = arith.andi %159, %163 : vector<1x512xi1>
    %c-1_i32_77 = arith.constant -1 : i32
    %165 = vector.broadcast %c-1_i32_77 : i32 to vector<1x512xi32>
    %166 = arith.addi %1, %165 : vector<1x512xi32>
    %c0_i32_78 = arith.constant 0 : i32
    %167 = vector.broadcast %c0_i32_78 : i32 to vector<1x512xi32>
    %168 = arith.cmpi sge, %166, %167 : vector<1x512xi32>
    %169 = arith.andi %164, %168 : vector<1x512xi1>
    %c-1_i32_79 = arith.constant -1 : i32
    %170 = vector.broadcast %c-1_i32_79 : i32 to vector<1x512xi32>
    %171 = arith.addi %1, %170 : vector<1x512xi32>
    %c16_i32_80 = arith.constant 16 : i32
    %172 = vector.broadcast %c16_i32_80 : i32 to vector<1x512xi32>
    %173 = arith.cmpi slt, %171, %172 : vector<1x512xi32>
    %174 = arith.andi %169, %173 : vector<1x512xi1>
    %cst_81 = arith.constant 1.000000e+00 : f32
    %cst_82 = arith.constant 0.000000e+00 : f32
    %175 = vector.broadcast %cst_81 : f32 to vector<1x512xf32>
    %176 = vector.broadcast %cst_82 : f32 to vector<1x512xf32>
    %177 = arith.select %174, %175, %176 : vector<1x512xi1>, vector<1x512xf32>
    %178 = vector.broadcast %177 : vector<1x512xf32> to vector<8x512xf32>
    %179 = arith.mulf %155, %178 : vector<8x512xf32>
    %c6 = arith.constant 6 : index
    %c0_83 = arith.constant 0 : index
    %c0_84 = arith.constant 0 : index
    %180 = vector.load %arg3[%c6, %c0_83, %c0_84] : memref<9x8x8xf32, #tpu.memory_space<vmem>>, vector<1x8x8xf32>
    %181 = vector.shape_cast %180 : vector<1x8x8xf32> to vector<8x8xf32>
    %cst_85 = arith.constant dense<0.000000e+00> : vector<8x512xf32>
    %182 = tpu.matmul %181, %179, %cst_85 {dimension_numbers = #tpu.dot_dimension_numbers<[1], [0], [0], [1], [0, 0, 1, 1], [], []>} : vector<8x8xf32>, vector<8x512xf32>, vector<8x512xf32> -> vector<8x512xf32>
    %183 = arith.addf %154, %182 : vector<8x512xf32>
    %c496_i32 = arith.constant 496 : i32
    %184 = tpu.dynamic_rotate %2 by %c496_i32 dim 1 : vector<8x512xf32>, i32 -> vector<8x512xf32>
    %c1_i32_86 = arith.constant 1 : i32
    %185 = vector.broadcast %c1_i32_86 : i32 to vector<1x512xi32>
    %186 = arith.addi %0, %185 : vector<1x512xi32>
    %c0_i32_87 = arith.constant 0 : i32
    %187 = vector.broadcast %c0_i32_87 : i32 to vector<1x512xi32>
    %188 = arith.cmpi sge, %186, %187 : vector<1x512xi32>
    %c1_i32_88 = arith.constant 1 : i32
    %189 = vector.broadcast %c1_i32_88 : i32 to vector<1x512xi32>
    %190 = arith.addi %0, %189 : vector<1x512xi32>
    %c16_i32_89 = arith.constant 16 : i32
    %191 = vector.broadcast %c16_i32_89 : i32 to vector<1x512xi32>
    %192 = arith.cmpi slt, %190, %191 : vector<1x512xi32>
    %193 = arith.andi %188, %192 : vector<1x512xi1>
    %c0_i32_90 = arith.constant 0 : i32
    %194 = vector.broadcast %c0_i32_90 : i32 to vector<1x512xi32>
    %195 = arith.addi %1, %194 : vector<1x512xi32>
    %c0_i32_91 = arith.constant 0 : i32
    %196 = vector.broadcast %c0_i32_91 : i32 to vector<1x512xi32>
    %197 = arith.cmpi sge, %195, %196 : vector<1x512xi32>
    %198 = arith.andi %193, %197 : vector<1x512xi1>
    %c0_i32_92 = arith.constant 0 : i32
    %199 = vector.broadcast %c0_i32_92 : i32 to vector<1x512xi32>
    %200 = arith.addi %1, %199 : vector<1x512xi32>
    %c16_i32_93 = arith.constant 16 : i32
    %201 = vector.broadcast %c16_i32_93 : i32 to vector<1x512xi32>
    %202 = arith.cmpi slt, %200, %201 : vector<1x512xi32>
    %203 = arith.andi %198, %202 : vector<1x512xi1>
    %cst_94 = arith.constant 1.000000e+00 : f32
    %cst_95 = arith.constant 0.000000e+00 : f32
    %204 = vector.broadcast %cst_94 : f32 to vector<1x512xf32>
    %205 = vector.broadcast %cst_95 : f32 to vector<1x512xf32>
    %206 = arith.select %203, %204, %205 : vector<1x512xi1>, vector<1x512xf32>
    %207 = vector.broadcast %206 : vector<1x512xf32> to vector<8x512xf32>
    %208 = arith.mulf %184, %207 : vector<8x512xf32>
    %c7 = arith.constant 7 : index
    %c0_96 = arith.constant 0 : index
    %c0_97 = arith.constant 0 : index
    %209 = vector.load %arg3[%c7, %c0_96, %c0_97] : memref<9x8x8xf32, #tpu.memory_space<vmem>>, vector<1x8x8xf32>
    %210 = vector.shape_cast %209 : vector<1x8x8xf32> to vector<8x8xf32>
    %cst_98 = arith.constant dense<0.000000e+00> : vector<8x512xf32>
    %211 = tpu.matmul %210, %208, %cst_98 {dimension_numbers = #tpu.dot_dimension_numbers<[1], [0], [0], [1], [0, 0, 1, 1], [], []>} : vector<8x8xf32>, vector<8x512xf32>, vector<8x512xf32> -> vector<8x512xf32>
    %212 = arith.addf %183, %211 : vector<8x512xf32>
    %c495_i32 = arith.constant 495 : i32
    %213 = tpu.dynamic_rotate %2 by %c495_i32 dim 1 : vector<8x512xf32>, i32 -> vector<8x512xf32>
    %c1_i32_99 = arith.constant 1 : i32
    %214 = vector.broadcast %c1_i32_99 : i32 to vector<1x512xi32>
    %215 = arith.addi %0, %214 : vector<1x512xi32>
    %c0_i32_100 = arith.constant 0 : i32
    %216 = vector.broadcast %c0_i32_100 : i32 to vector<1x512xi32>
    %217 = arith.cmpi sge, %215, %216 : vector<1x512xi32>
    %c1_i32_101 = arith.constant 1 : i32
    %218 = vector.broadcast %c1_i32_101 : i32 to vector<1x512xi32>
    %219 = arith.addi %0, %218 : vector<1x512xi32>
    %c16_i32_102 = arith.constant 16 : i32
    %220 = vector.broadcast %c16_i32_102 : i32 to vector<1x512xi32>
    %221 = arith.cmpi slt, %219, %220 : vector<1x512xi32>
    %222 = arith.andi %217, %221 : vector<1x512xi1>
    %c1_i32_103 = arith.constant 1 : i32
    %223 = vector.broadcast %c1_i32_103 : i32 to vector<1x512xi32>
    %224 = arith.addi %1, %223 : vector<1x512xi32>
    %c0_i32_104 = arith.constant 0 : i32
    %225 = vector.broadcast %c0_i32_104 : i32 to vector<1x512xi32>
    %226 = arith.cmpi sge, %224, %225 : vector<1x512xi32>
    %227 = arith.andi %222, %226 : vector<1x512xi1>
    %c1_i32_105 = arith.constant 1 : i32
    %228 = vector.broadcast %c1_i32_105 : i32 to vector<1x512xi32>
    %229 = arith.addi %1, %228 : vector<1x512xi32>
    %c16_i32_106 = arith.constant 16 : i32
    %230 = vector.broadcast %c16_i32_106 : i32 to vector<1x512xi32>
    %231 = arith.cmpi slt, %229, %230 : vector<1x512xi32>
    %232 = arith.andi %227, %231 : vector<1x512xi1>
    %cst_107 = arith.constant 1.000000e+00 : f32
    %cst_108 = arith.constant 0.000000e+00 : f32
    %233 = vector.broadcast %cst_107 : f32 to vector<1x512xf32>
    %234 = vector.broadcast %cst_108 : f32 to vector<1x512xf32>
    %235 = arith.select %232, %233, %234 : vector<1x512xi1>, vector<1x512xf32>
    %236 = vector.broadcast %235 : vector<1x512xf32> to vector<8x512xf32>
    %237 = arith.mulf %213, %236 : vector<8x512xf32>
    %c8 = arith.constant 8 : index
    %c0_109 = arith.constant 0 : index
    %c0_110 = arith.constant 0 : index
    %238 = vector.load %arg3[%c8, %c0_109, %c0_110] : memref<9x8x8xf32, #tpu.memory_space<vmem>>, vector<1x8x8xf32>
    %239 = vector.shape_cast %238 : vector<1x8x8xf32> to vector<8x8xf32>
    %cst_111 = arith.constant dense<0.000000e+00> : vector<8x512xf32>
    %240 = tpu.matmul %239, %237, %cst_111 {dimension_numbers = #tpu.dot_dimension_numbers<[1], [0], [0], [1], [0, 0, 1, 1], [], []>} : vector<8x8xf32>, vector<8x512xf32>, vector<8x512xf32> -> vector<8x512xf32>
    %241 = arith.addf %212, %240 : vector<8x512xf32>
    %c0_112 = arith.constant 0 : index
    %c0_113 = arith.constant 0 : index
    %242 = vector.load %arg6[%c0_112, %c0_113] : memref<8x1xf32, #tpu.memory_space<vmem>>, vector<8x1xf32>
    %243 = vector.shape_cast %242 : vector<8x1xf32> to vector<8x1xf32>
    %244 = vector.broadcast %243 : vector<8x1xf32> to vector<8x512xf32>
    %c17_i32_114 = arith.constant 17 : i32
    %245 = tpu.dynamic_rotate %241 by %c17_i32_114 dim 1 : vector<8x512xf32>, i32 -> vector<8x512xf32>
    %c-1_i32_115 = arith.constant -1 : i32
    %246 = vector.broadcast %c-1_i32_115 : i32 to vector<1x512xi32>
    %247 = arith.addi %0, %246 : vector<1x512xi32>
    %c0_i32_116 = arith.constant 0 : i32
    %248 = vector.broadcast %c0_i32_116 : i32 to vector<1x512xi32>
    %249 = arith.cmpi sge, %247, %248 : vector<1x512xi32>
    %c-1_i32_117 = arith.constant -1 : i32
    %250 = vector.broadcast %c-1_i32_117 : i32 to vector<1x512xi32>
    %251 = arith.addi %0, %250 : vector<1x512xi32>
    %c16_i32_118 = arith.constant 16 : i32
    %252 = vector.broadcast %c16_i32_118 : i32 to vector<1x512xi32>
    %253 = arith.cmpi slt, %251, %252 : vector<1x512xi32>
    %254 = arith.andi %249, %253 : vector<1x512xi1>
    %c-1_i32_119 = arith.constant -1 : i32
    %255 = vector.broadcast %c-1_i32_119 : i32 to vector<1x512xi32>
    %256 = arith.addi %1, %255 : vector<1x512xi32>
    %c0_i32_120 = arith.constant 0 : i32
    %257 = vector.broadcast %c0_i32_120 : i32 to vector<1x512xi32>
    %258 = arith.cmpi sge, %256, %257 : vector<1x512xi32>
    %259 = arith.andi %254, %258 : vector<1x512xi1>
    %c-1_i32_121 = arith.constant -1 : i32
    %260 = vector.broadcast %c-1_i32_121 : i32 to vector<1x512xi32>
    %261 = arith.addi %1, %260 : vector<1x512xi32>
    %c16_i32_122 = arith.constant 16 : i32
    %262 = vector.broadcast %c16_i32_122 : i32 to vector<1x512xi32>
    %263 = arith.cmpi slt, %261, %262 : vector<1x512xi32>
    %264 = arith.andi %259, %263 : vector<1x512xi1>
    %cst_123 = arith.constant 1.000000e+00 : f32
    %cst_124 = arith.constant 0.000000e+00 : f32
    %265 = vector.broadcast %cst_123 : f32 to vector<1x512xf32>
    %266 = vector.broadcast %cst_124 : f32 to vector<1x512xf32>
    %267 = arith.select %264, %265, %266 : vector<1x512xi1>, vector<1x512xf32>
    %268 = vector.broadcast %267 : vector<1x512xf32> to vector<8x512xf32>
    %269 = arith.mulf %245, %268 : vector<8x512xf32>
    %c0_125 = arith.constant 0 : index
    %c0_126 = arith.constant 0 : index
    %c0_127 = arith.constant 0 : index
    %270 = vector.load %arg5[%c0_125, %c0_126, %c0_127] : memref<9x8x8xf32, #tpu.memory_space<vmem>>, vector<1x8x8xf32>
    %271 = vector.shape_cast %270 : vector<1x8x8xf32> to vector<8x8xf32>
    %cst_128 = arith.constant dense<0.000000e+00> : vector<8x512xf32>
    %272 = tpu.matmul %271, %269, %cst_128 {dimension_numbers = #tpu.dot_dimension_numbers<[1], [0], [0], [1], [0, 0, 1, 1], [], []>} : vector<8x8xf32>, vector<8x512xf32>, vector<8x512xf32> -> vector<8x512xf32>
    %273 = arith.addf %244, %272 : vector<8x512xf32>
    %c16_i32_129 = arith.constant 16 : i32
    %274 = tpu.dynamic_rotate %241 by %c16_i32_129 dim 1 : vector<8x512xf32>, i32 -> vector<8x512xf32>
    %c-1_i32_130 = arith.constant -1 : i32
    %275 = vector.broadcast %c-1_i32_130 : i32 to vector<1x512xi32>
    %276 = arith.addi %0, %275 : vector<1x512xi32>
    %c0_i32_131 = arith.constant 0 : i32
    %277 = vector.broadcast %c0_i32_131 : i32 to vector<1x512xi32>
    %278 = arith.cmpi sge, %276, %277 : vector<1x512xi32>
    %c-1_i32_132 = arith.constant -1 : i32
    %279 = vector.broadcast %c-1_i32_132 : i32 to vector<1x512xi32>
    %280 = arith.addi %0, %279 : vector<1x512xi32>
    %c16_i32_133 = arith.constant 16 : i32
    %281 = vector.broadcast %c16_i32_133 : i32 to vector<1x512xi32>
    %282 = arith.cmpi slt, %280, %281 : vector<1x512xi32>
    %283 = arith.andi %278, %282 : vector<1x512xi1>
    %c0_i32_134 = arith.constant 0 : i32
    %284 = vector.broadcast %c0_i32_134 : i32 to vector<1x512xi32>
    %285 = arith.addi %1, %284 : vector<1x512xi32>
    %c0_i32_135 = arith.constant 0 : i32
    %286 = vector.broadcast %c0_i32_135 : i32 to vector<1x512xi32>
    %287 = arith.cmpi sge, %285, %286 : vector<1x512xi32>
    %288 = arith.andi %283, %287 : vector<1x512xi1>
    %c0_i32_136 = arith.constant 0 : i32
    %289 = vector.broadcast %c0_i32_136 : i32 to vector<1x512xi32>
    %290 = arith.addi %1, %289 : vector<1x512xi32>
    %c16_i32_137 = arith.constant 16 : i32
    %291 = vector.broadcast %c16_i32_137 : i32 to vector<1x512xi32>
    %292 = arith.cmpi slt, %290, %291 : vector<1x512xi32>
    %293 = arith.andi %288, %292 : vector<1x512xi1>
    %cst_138 = arith.constant 1.000000e+00 : f32
    %cst_139 = arith.constant 0.000000e+00 : f32
    %294 = vector.broadcast %cst_138 : f32 to vector<1x512xf32>
    %295 = vector.broadcast %cst_139 : f32 to vector<1x512xf32>
    %296 = arith.select %293, %294, %295 : vector<1x512xi1>, vector<1x512xf32>
    %297 = vector.broadcast %296 : vector<1x512xf32> to vector<8x512xf32>
    %298 = arith.mulf %274, %297 : vector<8x512xf32>
    %c1_140 = arith.constant 1 : index
    %c0_141 = arith.constant 0 : index
    %c0_142 = arith.constant 0 : index
    %299 = vector.load %arg5[%c1_140, %c0_141, %c0_142] : memref<9x8x8xf32, #tpu.memory_space<vmem>>, vector<1x8x8xf32>
    %300 = vector.shape_cast %299 : vector<1x8x8xf32> to vector<8x8xf32>
    %cst_143 = arith.constant dense<0.000000e+00> : vector<8x512xf32>
    %301 = tpu.matmul %300, %298, %cst_143 {dimension_numbers = #tpu.dot_dimension_numbers<[1], [0], [0], [1], [0, 0, 1, 1], [], []>} : vector<8x8xf32>, vector<8x512xf32>, vector<8x512xf32> -> vector<8x512xf32>
    %302 = arith.addf %273, %301 : vector<8x512xf32>
    %c15_i32_144 = arith.constant 15 : i32
    %303 = tpu.dynamic_rotate %241 by %c15_i32_144 dim 1 : vector<8x512xf32>, i32 -> vector<8x512xf32>
    %c-1_i32_145 = arith.constant -1 : i32
    %304 = vector.broadcast %c-1_i32_145 : i32 to vector<1x512xi32>
    %305 = arith.addi %0, %304 : vector<1x512xi32>
    %c0_i32_146 = arith.constant 0 : i32
    %306 = vector.broadcast %c0_i32_146 : i32 to vector<1x512xi32>
    %307 = arith.cmpi sge, %305, %306 : vector<1x512xi32>
    %c-1_i32_147 = arith.constant -1 : i32
    %308 = vector.broadcast %c-1_i32_147 : i32 to vector<1x512xi32>
    %309 = arith.addi %0, %308 : vector<1x512xi32>
    %c16_i32_148 = arith.constant 16 : i32
    %310 = vector.broadcast %c16_i32_148 : i32 to vector<1x512xi32>
    %311 = arith.cmpi slt, %309, %310 : vector<1x512xi32>
    %312 = arith.andi %307, %311 : vector<1x512xi1>
    %c1_i32_149 = arith.constant 1 : i32
    %313 = vector.broadcast %c1_i32_149 : i32 to vector<1x512xi32>
    %314 = arith.addi %1, %313 : vector<1x512xi32>
    %c0_i32_150 = arith.constant 0 : i32
    %315 = vector.broadcast %c0_i32_150 : i32 to vector<1x512xi32>
    %316 = arith.cmpi sge, %314, %315 : vector<1x512xi32>
    %317 = arith.andi %312, %316 : vector<1x512xi1>
    %c1_i32_151 = arith.constant 1 : i32
    %318 = vector.broadcast %c1_i32_151 : i32 to vector<1x512xi32>
    %319 = arith.addi %1, %318 : vector<1x512xi32>
    %c16_i32_152 = arith.constant 16 : i32
    %320 = vector.broadcast %c16_i32_152 : i32 to vector<1x512xi32>
    %321 = arith.cmpi slt, %319, %320 : vector<1x512xi32>
    %322 = arith.andi %317, %321 : vector<1x512xi1>
    %cst_153 = arith.constant 1.000000e+00 : f32
    %cst_154 = arith.constant 0.000000e+00 : f32
    %323 = vector.broadcast %cst_153 : f32 to vector<1x512xf32>
    %324 = vector.broadcast %cst_154 : f32 to vector<1x512xf32>
    %325 = arith.select %322, %323, %324 : vector<1x512xi1>, vector<1x512xf32>
    %326 = vector.broadcast %325 : vector<1x512xf32> to vector<8x512xf32>
    %327 = arith.mulf %303, %326 : vector<8x512xf32>
    %c2_155 = arith.constant 2 : index
    %c0_156 = arith.constant 0 : index
    %c0_157 = arith.constant 0 : index
    %328 = vector.load %arg5[%c2_155, %c0_156, %c0_157] : memref<9x8x8xf32, #tpu.memory_space<vmem>>, vector<1x8x8xf32>
    %329 = vector.shape_cast %328 : vector<1x8x8xf32> to vector<8x8xf32>
    %cst_158 = arith.constant dense<0.000000e+00> : vector<8x512xf32>
    %330 = tpu.matmul %329, %327, %cst_158 {dimension_numbers = #tpu.dot_dimension_numbers<[1], [0], [0], [1], [0, 0, 1, 1], [], []>} : vector<8x8xf32>, vector<8x512xf32>, vector<8x512xf32> -> vector<8x512xf32>
    %331 = arith.addf %302, %330 : vector<8x512xf32>
    %c1_i32_159 = arith.constant 1 : i32
    %332 = tpu.dynamic_rotate %241 by %c1_i32_159 dim 1 : vector<8x512xf32>, i32 -> vector<8x512xf32>
    %c0_i32_160 = arith.constant 0 : i32
    %333 = vector.broadcast %c0_i32_160 : i32 to vector<1x512xi32>
    %334 = arith.addi %0, %333 : vector<1x512xi32>
    %c0_i32_161 = arith.constant 0 : i32
    %335 = vector.broadcast %c0_i32_161 : i32 to vector<1x512xi32>
    %336 = arith.cmpi sge, %334, %335 : vector<1x512xi32>
    %c0_i32_162 = arith.constant 0 : i32
    %337 = vector.broadcast %c0_i32_162 : i32 to vector<1x512xi32>
    %338 = arith.addi %0, %337 : vector<1x512xi32>
    %c16_i32_163 = arith.constant 16 : i32
    %339 = vector.broadcast %c16_i32_163 : i32 to vector<1x512xi32>
    %340 = arith.cmpi slt, %338, %339 : vector<1x512xi32>
    %341 = arith.andi %336, %340 : vector<1x512xi1>
    %c-1_i32_164 = arith.constant -1 : i32
    %342 = vector.broadcast %c-1_i32_164 : i32 to vector<1x512xi32>
    %343 = arith.addi %1, %342 : vector<1x512xi32>
    %c0_i32_165 = arith.constant 0 : i32
    %344 = vector.broadcast %c0_i32_165 : i32 to vector<1x512xi32>
    %345 = arith.cmpi sge, %343, %344 : vector<1x512xi32>
    %346 = arith.andi %341, %345 : vector<1x512xi1>
    %c-1_i32_166 = arith.constant -1 : i32
    %347 = vector.broadcast %c-1_i32_166 : i32 to vector<1x512xi32>
    %348 = arith.addi %1, %347 : vector<1x512xi32>
    %c16_i32_167 = arith.constant 16 : i32
    %349 = vector.broadcast %c16_i32_167 : i32 to vector<1x512xi32>
    %350 = arith.cmpi slt, %348, %349 : vector<1x512xi32>
    %351 = arith.andi %346, %350 : vector<1x512xi1>
    %cst_168 = arith.constant 1.000000e+00 : f32
    %cst_169 = arith.constant 0.000000e+00 : f32
    %352 = vector.broadcast %cst_168 : f32 to vector<1x512xf32>
    %353 = vector.broadcast %cst_169 : f32 to vector<1x512xf32>
    %354 = arith.select %351, %352, %353 : vector<1x512xi1>, vector<1x512xf32>
    %355 = vector.broadcast %354 : vector<1x512xf32> to vector<8x512xf32>
    %356 = arith.mulf %332, %355 : vector<8x512xf32>
    %c3_170 = arith.constant 3 : index
    %c0_171 = arith.constant 0 : index
    %c0_172 = arith.constant 0 : index
    %357 = vector.load %arg5[%c3_170, %c0_171, %c0_172] : memref<9x8x8xf32, #tpu.memory_space<vmem>>, vector<1x8x8xf32>
    %358 = vector.shape_cast %357 : vector<1x8x8xf32> to vector<8x8xf32>
    %cst_173 = arith.constant dense<0.000000e+00> : vector<8x512xf32>
    %359 = tpu.matmul %358, %356, %cst_173 {dimension_numbers = #tpu.dot_dimension_numbers<[1], [0], [0], [1], [0, 0, 1, 1], [], []>} : vector<8x8xf32>, vector<8x512xf32>, vector<8x512xf32> -> vector<8x512xf32>
    %360 = arith.addf %331, %359 : vector<8x512xf32>
    %c4_174 = arith.constant 4 : index
    %c0_175 = arith.constant 0 : index
    %c0_176 = arith.constant 0 : index
    %361 = vector.load %arg5[%c4_174, %c0_175, %c0_176] : memref<9x8x8xf32, #tpu.memory_space<vmem>>, vector<1x8x8xf32>
    %362 = vector.shape_cast %361 : vector<1x8x8xf32> to vector<8x8xf32>
    %cst_177 = arith.constant dense<0.000000e+00> : vector<8x512xf32>
    %363 = tpu.matmul %362, %241, %cst_177 {dimension_numbers = #tpu.dot_dimension_numbers<[1], [0], [0], [1], [0, 0, 1, 1], [], []>} : vector<8x8xf32>, vector<8x512xf32>, vector<8x512xf32> -> vector<8x512xf32>
    %364 = arith.addf %360, %363 : vector<8x512xf32>
    %c511_i32_178 = arith.constant 511 : i32
    %365 = tpu.dynamic_rotate %241 by %c511_i32_178 dim 1 : vector<8x512xf32>, i32 -> vector<8x512xf32>
    %c0_i32_179 = arith.constant 0 : i32
    %366 = vector.broadcast %c0_i32_179 : i32 to vector<1x512xi32>
    %367 = arith.addi %0, %366 : vector<1x512xi32>
    %c0_i32_180 = arith.constant 0 : i32
    %368 = vector.broadcast %c0_i32_180 : i32 to vector<1x512xi32>
    %369 = arith.cmpi sge, %367, %368 : vector<1x512xi32>
    %c0_i32_181 = arith.constant 0 : i32
    %370 = vector.broadcast %c0_i32_181 : i32 to vector<1x512xi32>
    %371 = arith.addi %0, %370 : vector<1x512xi32>
    %c16_i32_182 = arith.constant 16 : i32
    %372 = vector.broadcast %c16_i32_182 : i32 to vector<1x512xi32>
    %373 = arith.cmpi slt, %371, %372 : vector<1x512xi32>
    %374 = arith.andi %369, %373 : vector<1x512xi1>
    %c1_i32_183 = arith.constant 1 : i32
    %375 = vector.broadcast %c1_i32_183 : i32 to vector<1x512xi32>
    %376 = arith.addi %1, %375 : vector<1x512xi32>
    %c0_i32_184 = arith.constant 0 : i32
    %377 = vector.broadcast %c0_i32_184 : i32 to vector<1x512xi32>
    %378 = arith.cmpi sge, %376, %377 : vector<1x512xi32>
    %379 = arith.andi %374, %378 : vector<1x512xi1>
    %c1_i32_185 = arith.constant 1 : i32
    %380 = vector.broadcast %c1_i32_185 : i32 to vector<1x512xi32>
    %381 = arith.addi %1, %380 : vector<1x512xi32>
    %c16_i32_186 = arith.constant 16 : i32
    %382 = vector.broadcast %c16_i32_186 : i32 to vector<1x512xi32>
    %383 = arith.cmpi slt, %381, %382 : vector<1x512xi32>
    %384 = arith.andi %379, %383 : vector<1x512xi1>
    %cst_187 = arith.constant 1.000000e+00 : f32
    %cst_188 = arith.constant 0.000000e+00 : f32
    %385 = vector.broadcast %cst_187 : f32 to vector<1x512xf32>
    %386 = vector.broadcast %cst_188 : f32 to vector<1x512xf32>
    %387 = arith.select %384, %385, %386 : vector<1x512xi1>, vector<1x512xf32>
    %388 = vector.broadcast %387 : vector<1x512xf32> to vector<8x512xf32>
    %389 = arith.mulf %365, %388 : vector<8x512xf32>
    %c5_189 = arith.constant 5 : index
    %c0_190 = arith.constant 0 : index
    %c0_191 = arith.constant 0 : index
    %390 = vector.load %arg5[%c5_189, %c0_190, %c0_191] : memref<9x8x8xf32, #tpu.memory_space<vmem>>, vector<1x8x8xf32>
    %391 = vector.shape_cast %390 : vector<1x8x8xf32> to vector<8x8xf32>
    %cst_192 = arith.constant dense<0.000000e+00> : vector<8x512xf32>
    %392 = tpu.matmul %391, %389, %cst_192 {dimension_numbers = #tpu.dot_dimension_numbers<[1], [0], [0], [1], [0, 0, 1, 1], [], []>} : vector<8x8xf32>, vector<8x512xf32>, vector<8x512xf32> -> vector<8x512xf32>
    %393 = arith.addf %364, %392 : vector<8x512xf32>
    %c497_i32_193 = arith.constant 497 : i32
    %394 = tpu.dynamic_rotate %241 by %c497_i32_193 dim 1 : vector<8x512xf32>, i32 -> vector<8x512xf32>
    %c1_i32_194 = arith.constant 1 : i32
    %395 = vector.broadcast %c1_i32_194 : i32 to vector<1x512xi32>
    %396 = arith.addi %0, %395 : vector<1x512xi32>
    %c0_i32_195 = arith.constant 0 : i32
    %397 = vector.broadcast %c0_i32_195 : i32 to vector<1x512xi32>
    %398 = arith.cmpi sge, %396, %397 : vector<1x512xi32>
    %c1_i32_196 = arith.constant 1 : i32
    %399 = vector.broadcast %c1_i32_196 : i32 to vector<1x512xi32>
    %400 = arith.addi %0, %399 : vector<1x512xi32>
    %c16_i32_197 = arith.constant 16 : i32
    %401 = vector.broadcast %c16_i32_197 : i32 to vector<1x512xi32>
    %402 = arith.cmpi slt, %400, %401 : vector<1x512xi32>
    %403 = arith.andi %398, %402 : vector<1x512xi1>
    %c-1_i32_198 = arith.constant -1 : i32
    %404 = vector.broadcast %c-1_i32_198 : i32 to vector<1x512xi32>
    %405 = arith.addi %1, %404 : vector<1x512xi32>
    %c0_i32_199 = arith.constant 0 : i32
    %406 = vector.broadcast %c0_i32_199 : i32 to vector<1x512xi32>
    %407 = arith.cmpi sge, %405, %406 : vector<1x512xi32>
    %408 = arith.andi %403, %407 : vector<1x512xi1>
    %c-1_i32_200 = arith.constant -1 : i32
    %409 = vector.broadcast %c-1_i32_200 : i32 to vector<1x512xi32>
    %410 = arith.addi %1, %409 : vector<1x512xi32>
    %c16_i32_201 = arith.constant 16 : i32
    %411 = vector.broadcast %c16_i32_201 : i32 to vector<1x512xi32>
    %412 = arith.cmpi slt, %410, %411 : vector<1x512xi32>
    %413 = arith.andi %408, %412 : vector<1x512xi1>
    %cst_202 = arith.constant 1.000000e+00 : f32
    %cst_203 = arith.constant 0.000000e+00 : f32
    %414 = vector.broadcast %cst_202 : f32 to vector<1x512xf32>
    %415 = vector.broadcast %cst_203 : f32 to vector<1x512xf32>
    %416 = arith.select %413, %414, %415 : vector<1x512xi1>, vector<1x512xf32>
    %417 = vector.broadcast %416 : vector<1x512xf32> to vector<8x512xf32>
    %418 = arith.mulf %394, %417 : vector<8x512xf32>
    %c6_204 = arith.constant 6 : index
    %c0_205 = arith.constant 0 : index
    %c0_206 = arith.constant 0 : index
    %419 = vector.load %arg5[%c6_204, %c0_205, %c0_206] : memref<9x8x8xf32, #tpu.memory_space<vmem>>, vector<1x8x8xf32>
    %420 = vector.shape_cast %419 : vector<1x8x8xf32> to vector<8x8xf32>
    %cst_207 = arith.constant dense<0.000000e+00> : vector<8x512xf32>
    %421 = tpu.matmul %420, %418, %cst_207 {dimension_numbers = #tpu.dot_dimension_numbers<[1], [0], [0], [1], [0, 0, 1, 1], [], []>} : vector<8x8xf32>, vector<8x512xf32>, vector<8x512xf32> -> vector<8x512xf32>
    %422 = arith.addf %393, %421 : vector<8x512xf32>
    %c496_i32_208 = arith.constant 496 : i32
    %423 = tpu.dynamic_rotate %241 by %c496_i32_208 dim 1 : vector<8x512xf32>, i32 -> vector<8x512xf32>
    %c1_i32_209 = arith.constant 1 : i32
    %424 = vector.broadcast %c1_i32_209 : i32 to vector<1x512xi32>
    %425 = arith.addi %0, %424 : vector<1x512xi32>
    %c0_i32_210 = arith.constant 0 : i32
    %426 = vector.broadcast %c0_i32_210 : i32 to vector<1x512xi32>
    %427 = arith.cmpi sge, %425, %426 : vector<1x512xi32>
    %c1_i32_211 = arith.constant 1 : i32
    %428 = vector.broadcast %c1_i32_211 : i32 to vector<1x512xi32>
    %429 = arith.addi %0, %428 : vector<1x512xi32>
    %c16_i32_212 = arith.constant 16 : i32
    %430 = vector.broadcast %c16_i32_212 : i32 to vector<1x512xi32>
    %431 = arith.cmpi slt, %429, %430 : vector<1x512xi32>
    %432 = arith.andi %427, %431 : vector<1x512xi1>
    %c0_i32_213 = arith.constant 0 : i32
    %433 = vector.broadcast %c0_i32_213 : i32 to vector<1x512xi32>
    %434 = arith.addi %1, %433 : vector<1x512xi32>
    %c0_i32_214 = arith.constant 0 : i32
    %435 = vector.broadcast %c0_i32_214 : i32 to vector<1x512xi32>
    %436 = arith.cmpi sge, %434, %435 : vector<1x512xi32>
    %437 = arith.andi %432, %436 : vector<1x512xi1>
    %c0_i32_215 = arith.constant 0 : i32
    %438 = vector.broadcast %c0_i32_215 : i32 to vector<1x512xi32>
    %439 = arith.addi %1, %438 : vector<1x512xi32>
    %c16_i32_216 = arith.constant 16 : i32
    %440 = vector.broadcast %c16_i32_216 : i32 to vector<1x512xi32>
    %441 = arith.cmpi slt, %439, %440 : vector<1x512xi32>
    %442 = arith.andi %437, %441 : vector<1x512xi1>
    %cst_217 = arith.constant 1.000000e+00 : f32
    %cst_218 = arith.constant 0.000000e+00 : f32
    %443 = vector.broadcast %cst_217 : f32 to vector<1x512xf32>
    %444 = vector.broadcast %cst_218 : f32 to vector<1x512xf32>
    %445 = arith.select %442, %443, %444 : vector<1x512xi1>, vector<1x512xf32>
    %446 = vector.broadcast %445 : vector<1x512xf32> to vector<8x512xf32>
    %447 = arith.mulf %423, %446 : vector<8x512xf32>
    %c7_219 = arith.constant 7 : index
    %c0_220 = arith.constant 0 : index
    %c0_221 = arith.constant 0 : index
    %448 = vector.load %arg5[%c7_219, %c0_220, %c0_221] : memref<9x8x8xf32, #tpu.memory_space<vmem>>, vector<1x8x8xf32>
    %449 = vector.shape_cast %448 : vector<1x8x8xf32> to vector<8x8xf32>
    %cst_222 = arith.constant dense<0.000000e+00> : vector<8x512xf32>
    %450 = tpu.matmul %449, %447, %cst_222 {dimension_numbers = #tpu.dot_dimension_numbers<[1], [0], [0], [1], [0, 0, 1, 1], [], []>} : vector<8x8xf32>, vector<8x512xf32>, vector<8x512xf32> -> vector<8x512xf32>
    %451 = arith.addf %422, %450 : vector<8x512xf32>
    %c495_i32_223 = arith.constant 495 : i32
    %452 = tpu.dynamic_rotate %241 by %c495_i32_223 dim 1 : vector<8x512xf32>, i32 -> vector<8x512xf32>
    %c1_i32_224 = arith.constant 1 : i32
    %453 = vector.broadcast %c1_i32_224 : i32 to vector<1x512xi32>
    %454 = arith.addi %0, %453 : vector<1x512xi32>
    %c0_i32_225 = arith.constant 0 : i32
    %455 = vector.broadcast %c0_i32_225 : i32 to vector<1x512xi32>
    %456 = arith.cmpi sge, %454, %455 : vector<1x512xi32>
    %c1_i32_226 = arith.constant 1 : i32
    %457 = vector.broadcast %c1_i32_226 : i32 to vector<1x512xi32>
    %458 = arith.addi %0, %457 : vector<1x512xi32>
    %c16_i32_227 = arith.constant 16 : i32
    %459 = vector.broadcast %c16_i32_227 : i32 to vector<1x512xi32>
    %460 = arith.cmpi slt, %458, %459 : vector<1x512xi32>
    %461 = arith.andi %456, %460 : vector<1x512xi1>
    %c1_i32_228 = arith.constant 1 : i32
    %462 = vector.broadcast %c1_i32_228 : i32 to vector<1x512xi32>
    %463 = arith.addi %1, %462 : vector<1x512xi32>
    %c0_i32_229 = arith.constant 0 : i32
    %464 = vector.broadcast %c0_i32_229 : i32 to vector<1x512xi32>
    %465 = arith.cmpi sge, %463, %464 : vector<1x512xi32>
    %466 = arith.andi %461, %465 : vector<1x512xi1>
    %c1_i32_230 = arith.constant 1 : i32
    %467 = vector.broadcast %c1_i32_230 : i32 to vector<1x512xi32>
    %468 = arith.addi %1, %467 : vector<1x512xi32>
    %c16_i32_231 = arith.constant 16 : i32
    %469 = vector.broadcast %c16_i32_231 : i32 to vector<1x512xi32>
    %470 = arith.cmpi slt, %468, %469 : vector<1x512xi32>
    %471 = arith.andi %466, %470 : vector<1x512xi1>
    %cst_232 = arith.constant 1.000000e+00 : f32
    %cst_233 = arith.constant 0.000000e+00 : f32
    %472 = vector.broadcast %cst_232 : f32 to vector<1x512xf32>
    %473 = vector.broadcast %cst_233 : f32 to vector<1x512xf32>
    %474 = arith.select %471, %472, %473 : vector<1x512xi1>, vector<1x512xf32>
    %475 = vector.broadcast %474 : vector<1x512xf32> to vector<8x512xf32>
    %476 = arith.mulf %452, %475 : vector<8x512xf32>
    %c8_234 = arith.constant 8 : index
    %c0_235 = arith.constant 0 : index
    %c0_236 = arith.constant 0 : index
    %477 = vector.load %arg5[%c8_234, %c0_235, %c0_236] : memref<9x8x8xf32, #tpu.memory_space<vmem>>, vector<1x8x8xf32>
    %478 = vector.shape_cast %477 : vector<1x8x8xf32> to vector<8x8xf32>
    %cst_237 = arith.constant dense<0.000000e+00> : vector<8x512xf32>
    %479 = tpu.matmul %478, %476, %cst_237 {dimension_numbers = #tpu.dot_dimension_numbers<[1], [0], [0], [1], [0, 0, 1, 1], [], []>} : vector<8x8xf32>, vector<8x512xf32>, vector<8x512xf32> -> vector<8x512xf32>
    %480 = arith.addf %451, %479 : vector<8x512xf32>
    %cst_238 = arith.constant 5.000000e-01 : f32
    %481 = vector.broadcast %cst_238 : f32 to vector<8x512xf32>
    %482 = arith.mulf %481, %480 : vector<8x512xf32>
    %cst_239 = arith.constant 0.707106769 : f32
    %483 = vector.broadcast %cst_239 : f32 to vector<8x512xf32>
    %484 = arith.mulf %480, %483 : vector<8x512xf32>
    %485 = math.absf %484 : vector<8x512xf32>
    %cst_240 = arith.constant 0.327591091 : f32
    %486 = vector.broadcast %cst_240 : f32 to vector<8x512xf32>
    %487 = arith.mulf %486, %485 : vector<8x512xf32>
    %cst_241 = arith.constant 1.000000e+00 : f32
    %488 = vector.broadcast %cst_241 : f32 to vector<8x512xf32>
    %489 = arith.addf %488, %487 : vector<8x512xf32>
    %cst_242 = arith.constant 1.000000e+00 : f32
    %490 = vector.broadcast %cst_242 : f32 to vector<8x512xf32>
    %491 = arith.divf %490, %489 : vector<8x512xf32>
    %cst_243 = arith.constant 1.06140542 : f32
    %492 = vector.broadcast %cst_243 : f32 to vector<8x512xf32>
    %493 = arith.mulf %491, %492 : vector<8x512xf32>
    %cst_244 = arith.constant -1.45315206 : f32
    %494 = vector.broadcast %cst_244 : f32 to vector<8x512xf32>
    %495 = arith.addf %494, %493 : vector<8x512xf32>
    %496 = arith.mulf %491, %495 : vector<8x512xf32>
    %cst_245 = arith.constant 1.42141378 : f32
    %497 = vector.broadcast %cst_245 : f32 to vector<8x512xf32>
    %498 = arith.addf %497, %496 : vector<8x512xf32>
    %499 = arith.mulf %491, %498 : vector<8x512xf32>
    %cst_246 = arith.constant -0.284496725 : f32
    %500 = vector.broadcast %cst_246 : f32 to vector<8x512xf32>
    %501 = arith.addf %500, %499 : vector<8x512xf32>
    %502 = arith.mulf %491, %501 : vector<8x512xf32>
    %cst_247 = arith.constant 0.254829586 : f32
    %503 = vector.broadcast %cst_247 : f32 to vector<8x512xf32>
    %504 = arith.addf %503, %502 : vector<8x512xf32>
    %505 = arith.mulf %491, %504 : vector<8x512xf32>
    %cst_248 = arith.constant 0.000000e+00 : f32
    %506 = vector.broadcast %cst_248 : f32 to vector<8x512xf32>
    %507 = arith.subf %506, %485 : vector<8x512xf32>
    %508 = arith.mulf %507, %485 : vector<8x512xf32>
    %509 = math.exp %508 : vector<8x512xf32>
    %510 = arith.mulf %505, %509 : vector<8x512xf32>
    %cst_249 = arith.constant 1.000000e+00 : f32
    %511 = vector.broadcast %cst_249 : f32 to vector<8x512xf32>
    %512 = arith.subf %511, %510 : vector<8x512xf32>
    %cst_250 = arith.constant 0.000000e+00 : f32
    %513 = vector.broadcast %cst_250 : f32 to vector<8x512xf32>
    %514 = arith.cmpf oge, %484, %513 : vector<8x512xf32>
    %cst_251 = arith.constant 0.000000e+00 : f32
    %515 = vector.broadcast %cst_251 : f32 to vector<8x512xf32>
    %516 = arith.subf %515, %512 : vector<8x512xf32>
    %517 = arith.select %514, %512, %516 : vector<8x512xi1>, vector<8x512xf32>
    %cst_252 = arith.constant 1.000000e+00 : f32
    %518 = vector.broadcast %cst_252 : f32 to vector<8x512xf32>
    %519 = arith.addf %518, %517 : vector<8x512xf32>
    %520 = arith.mulf %482, %519 : vector<8x512xf32>
    %c0_253 = arith.constant 0 : index
    %c0_254 = arith.constant 0 : index
    %521 = vector.load %arg2[%c0_253, %c0_254] : memref<8x512xf32, #tpu.memory_space<vmem>>, vector<8x512xf32>
    %522 = arith.addf %520, %521 : vector<8x512xf32>
    %c0_255 = arith.constant 0 : index
    %c0_256 = arith.constant 0 : index
    %523 = vector.load %arg7[%c0_255, %c0_256] : memref<8x512xf32, #tpu.memory_space<vmem>>, vector<8x512xf32>
    tpu.vector_store %arg7[%c0_255, %c0_256], %522 {strides = array<i32>} : memref<8x512xf32, #tpu.memory_space<vmem>>, vector<8x512xf32>,
    return
  }
  func.func @transform_0(%arg0: i32) -> (i32, i32) {
    %c0_i32 = arith.constant 0 : i32
    %c0_i32_0 = arith.constant 0 : i32
    return %c0_i32, %arg0 : i32, i32
  }
  func.func @transform_1(%arg0: i32) -> (i32, i32) {
    %c0_i32 = arith.constant 0 : i32
    %c0_i32_0 = arith.constant 0 : i32
    return %c0_i32, %arg0 : i32, i32
  }
  func.func @transform_2(%arg0: i32) -> (i32, i32, i32) {
    %c0_i32 = arith.constant 0 : i32
    %c0_i32_0 = arith.constant 0 : i32
    %c0_i32_1 = arith.constant 0 : i32
    %c0_i32_2 = arith.constant 0 : i32
    return %c0_i32, %c0_i32_0, %c0_i32_1 : i32, i32, i32
  }
  func.func @transform_3(%arg0: i32) -> (i32, i32) {
    %c0_i32 = arith.constant 0 : i32
    %c0_i32_0 = arith.constant 0 : i32
    %c0_i32_1 = arith.constant 0 : i32
    return %c0_i32, %c0_i32_0 : i32, i32
  }
  func.func @transform_4(%arg0: i32) -> (i32, i32, i32) {
    %c0_i32 = arith.constant 0 : i32
    %c0_i32_0 = arith.constant 0 : i32
    %c0_i32_1 = arith.constant 0 : i32
    %c0_i32_2 = arith.constant 0 : i32
    return %c0_i32, %c0_i32_0, %c0_i32_1 : i32, i32, i32
  }
  func.func @transform_5(%arg0: i32) -> (i32, i32) {
    %c0_i32 = arith.constant 0 : i32
    %c0_i32_0 = arith.constant 0 : i32
    %c0_i32_1 = arith.constant 0 : i32
    return %c0_i32, %c0_i32_0 : i32, i32
  }
  func.func @transform_6(%arg0: i32) -> (i32, i32) {
    %c0_i32 = arith.constant 0 : i32
    %c0_i32_0 = arith.constant 0 : i32
    return %c0_i32, %arg0 : i32, i32
  }
}

</mosaic_0001>

<bundles_post_ra>
// kernel: tpu_custom_call.1
= control target key start
LH: loop header
LB: loop body
LE: loop exit
PB: predicated region body
PF: predicated region fallthrough
CT: control target
= control target key end

     0   :  { %s3474_s25 = smov 17   ;;  %v4274_v4 = vmov 0.0   ;;  %s4267_s0 = inlined_call_operand.vmem [shape: s32[2,512], index: 0, kind: input, shape index: {}]   ;;  %s4268_s1 = inlined_call_operand.vmem [shape: f32[8,512], index: 1, kind: input, shape index: {}]   ;;  %s4269_s2 = inlined_call_operand.vmem [shape: f32[9,8,8], index: 2, kind: input, shape index: {}]   ;;  %s4270_s3 = inlined_call_operand.vmem [shape: f32[8,1], index: 3, kind: input, shape index: {}]   ;;  %s4271_s4 = inlined_call_operand.vmem [shape: f32[9,8,8], index: 4, kind: input, shape index: {}]   ;;  %s4272_s5 = inlined_call_operand.vmem [shape: f32[8,1], index: 5, kind: input, shape index: {}]   ;;  %s4273_s6 = inlined_call_operand.hbm [shape: f32[8,512], index: 6, kind: output, shape index: {}]  }
   0x1   :  { %v3523_v0 = vld [vmem:[%s4268_s1 + $0x10] sm:$0xff]  ;;  %v3528_v1 = vld [vmem:[%s4268_s1] sm:$0xff]  ;;  %v3537_v2 = vld [vmem:[%s4268_s1 + $0x18] sm:$0xff]  ;;  %156 = vmatprep.mubr.f32.mxu0 %v4274_v4  ;;  %227 = vmatprep.mubr.f32.mxu1 %v4274_v4 }
   0x2   :  { %41 = vrot.lane.b32.xlu1 %v3523_v0, %s3474_s25  ;;  %37 = vrot.lane.b32.xlu0 %v3528_v1, %s3474_s25  ;;  %v3542_v3 = vld [vmem:[%s4268_s1 + $0x8] sm:$0xff] }
   0x3   :  { %11 = vsyncpa [#allocation3], 0  ;;  %s3476_s30 = smov 16   ;;  %s3477_s7 = smov 15   ;;  %v3482_v5 = vmov 0   ;;  %v31_v6 = vld [vmem:[%s4270_s3] sm:$0xff]  ;;  %v45_v11 = vlaneseq }
   0x4   :  { %s3478_s8 = smov 1   ;;  %s3479_s9 = smov 127   ;;  %3431 = vset.pattern.permute.xlu0 %v3482_v5  ;;  %v3612_v7 = vld [vmem:[%s4267_s0] ss:$2 sm:$0xf]  ;;  %v3370_v58 = vld [vmem:[%s4269_s2 + $0x8] sm:$0xff] }
   0x5   :  { %s3480_s10 = smov 113   ;;  %s3481_s11 = smov 112   ;;  %v3617_v8 = vld [vmem:[%s4267_s0 + $0x1] ss:$2 sm:$0xf]  ;;  %v52_v9 = vadd.s32 4294967295, %v3612_v7 }
   0x6   :  { %43 = vrot.lane.b32.xlu1 %v3537_v2, %s3474_s25  ;;  %39 = vrot.lane.b32.xlu0 %v3542_v3, %s3474_s25  ;;  %s3483_s12 = smov 111   ;;  %v3621_v10 = vadd.s32 4294967295, %v3617_v8  ;;  %vm251_vm4 = vcmp.ge.s32.totalorder %v3617_v8, 0  ;;  %v64_v13 = vshrl.u32 %v45_v11, 7  ;;  %vm253_vm8 = vcmp.lt.s32.totalorder %v3617_v8, 16  ;;  %v87_v39 = vld [vmem:[%s4269_s2] sm:$0xff] }
   0x7   :  { %vm53_vm0 = vcmp.ge.s32.totalorder %v52_v9, 0  ;;  %vm54_vm1 = vcmp.lt.s32.totalorder %v52_v9, 16  ;;  %v3641_v14 = vand.u32 127, %v45_v11  ;;  %v3644_v15 = vadd.s32 1, %v3617_v8  ;;  %s3484_s16 = smov [#allocation2]  }
   0x8   :  { %vm3623_vm2 = vmand %vm53_vm0, %vm54_vm1  ;;  %vm57_vm3 = vcmp.ge.s32.totalorder %v3621_v10, 0  ;;  %vm59_vm6 = vcmp.lt.s32.totalorder %v3621_v10, 16  ;;  %v3646_v16 = vsub.s32 1, %v64_v13  ;;  %v3650_v17 = vsub.s32 3, %v64_v13  ;;  %s3359_s17 = sshll.u32 %s3484_s16, 4  ;;  %s3360_s17 = int_to_ptr.vmem [resolvable:$true] %s3359_s17 }
   0x9   :  { %vm58_vm5 = vmand %vm3623_vm2, %vm57_vm3  ;;  %v3652_v18 = vsub.s32 0, %v64_v13  ;;  %v3654_v19 = vsub.s32 2, %v64_v13  ;;  %vm47_vm11 = vcmp.lt.s32.totalorder %v3641_v14, 17  ;;  %vm446_vm12 = vcmp.ge.s32.totalorder %v3644_v15, 0  ;;  %p3457_p1 = scmp.lt.s32.totalorder %s3360_s17, %s3360_s17 }
   0xa   :  { %240 = vrot.lane.b32.xlu1 %v3542_v3, %s3476_s30  ;;  %238 = vrot.lane.b32.xlu0 %v3528_v1, %s3476_s30  ;;  %vm252_vm7 = vmand %vm3623_vm2, %vm251_vm4  ;;  %vm246_vm13 = vcmp.lt.s32.totalorder %v3641_v14, 16  ;;  %vm448_vm14 = vcmp.lt.s32.totalorder %v3644_v15, 16  ;;  %vm88_vm0 = vcmask 64512   ;;  %vm640_vm1 = vcmp.ge.s32.totalorder %v3612_v7, 0 }
   0xb   :  { %vm60_vm9 = vmand %vm58_vm5, %vm59_vm6  ;;  %vm641_vm5 = vcmp.lt.s32.totalorder %v3612_v7, 16 }
   0xc   :  { %vm254_vm10 = vmand %vm252_vm7, %vm253_vm8  ;;  %v61_v20 = vsel %vm60_vm9, 1.0, %v4274_v4  ;;  %vm440_vm9 = vcmp.lt.s32.totalorder %v3641_v14, 15 }
   0xd   :  { %v255_v23 = vsel %vm254_vm10, 1.0, %v4274_v4  ;;  %v3661_v24 = vrot.slane %v61_v20, %v3646_v16  ;;  %v3664_v25 = vrot.slane %v61_v20, %v3650_v17  ;;  %v3667_v26 = vrot.slane %v61_v20, %v3652_v18  ;;  %vm447_vm15 = vmand %vm3623_vm2, %vm446_vm12 }
   0xe   :  { %244 = vrot.lane.b32.xlu1 %v3537_v2, %s3476_s30  ;;  %242 = vrot.lane.b32.xlu0 %v3523_v0, %s3476_s30  ;;  %v3670_v27 = vrot.slane %v61_v20, %v3654_v19  ;;  %v3674_v30 = vrot.slane %v255_v23, %v3646_v16  ;;  %vm449_vm2 = vmand %vm447_vm15, %vm448_vm14  ;;  %v3703_v43 = vrot.slane %v255_v23, %v3652_v18 }
   0xf   :  { %v3707_v45 = vrot.slane %v255_v23, %v3654_v19  ;;  %v3710_v46 = vrot.slane %v255_v23, %v3650_v17  ;;  %vm3718_vm7 = vmand %vm640_vm1, %vm641_vm5  ;;  %v450_v48 = vsel %vm449_vm2, 1.0, %v4274_v4  ;;  %vm635_vm1 = vcmp.lt.s32.totalorder %v3641_v14, 1 }
  0x10   :  { %vm643_vm10 = vmand %vm3718_vm7, %vm57_vm3  ;;  %v3740_v57 = vrot.slane %v450_v48, %v3646_v16  ;;  %v3750_v62 = vrot.slane %v450_v48, %v3652_v18  ;;  %v3755_v5 = vrot.slane %v450_v48, %v3654_v19 }
  0x11   :  { %vm644_vm15 = vmand %vm643_vm10, %vm59_vm6 }
  0x12   :  { %434 = vrot.lane.b32.xlu1 %v3542_v3, %s3477_s7  ;;  %432 = vrot.lane.b32.xlu0 %v3528_v1, %s3477_s7  ;;  %v645_v9 = vsel %vm644_vm15, 1.0, %v4274_v4  ;;  %vm986_vm5 = vmand %vm3718_vm7, %vm446_vm12 }
  0x13   :  { %vm987_vm7 = vmand %vm986_vm5, %vm448_vm14  ;;  %vm981_vm5 = vcmp.lt.s32.totalorder %v3641_v14, 127 }
  0x16   :  { %438 = vrot.lane.b32.xlu1 %v3537_v2, %s3477_s7  ;;  %436 = vrot.lane.b32.xlu0 %v3523_v0, %s3477_s7 }
  0x1a   :  { %629 = vrot.lane.b32.xlu1 %v3542_v3, %s3478_s8  ;;  %627 = vrot.lane.b32.xlu0 %v3528_v1, %s3478_s8 }
  0x1e   :  { %633 = vrot.lane.b32.xlu1 %v3537_v2, %s3478_s8  ;;  %631 = vrot.lane.b32.xlu0 %v3523_v0, %s3478_s8 }
  0x22   :  { %975 = vrot.lane.b32.xlu1 %v3542_v3, %s3479_s9  ;;  %973 = vrot.lane.b32.xlu0 %v3528_v1, %s3479_s9 }
  0x26   :  { %979 = vrot.lane.b32.xlu1 %v3537_v2, %s3479_s9  ;;  %977 = vrot.lane.b32.xlu0 %v3523_v0, %s3479_s9 }
  0x2a   :  { %1167 = vrot.lane.b32.xlu1 %v3542_v3, %s3480_s10  ;;  %1165 = vrot.lane.b32.xlu0 %v3528_v1, %s3480_s10 }
  0x2e   :  { %1171 = vrot.lane.b32.xlu1 %v3537_v2, %s3480_s10  ;;  %1169 = vrot.lane.b32.xlu0 %v3523_v0, %s3480_s10 }
  0x32   :  { %1363 = vrot.lane.b32.xlu1 %v3542_v3, %s3481_s11  ;;  %1361 = vrot.lane.b32.xlu0 %v3528_v1, %s3481_s11 }
  0x36   :  { %1367 = vrot.lane.b32.xlu1 %v3537_v2, %s3481_s11  ;;  %1365 = vrot.lane.b32.xlu0 %v3523_v0, %s3481_s11 }
  0x3a   :  { %1555 = vrot.lane.b32.xlu1 %v3542_v3, %s3483_s12  ;;  %1553 = vrot.lane.b32.xlu0 %v3528_v1, %s3483_s12 }
  0x3e   :  { %1559 = vrot.lane.b32.xlu1 %v3537_v2, %s3483_s12  ;;  %1557 = vrot.lane.b32.xlu0 %v3523_v0, %s3483_s12 }
  0x42   :  { %34 = vperm.xlu0 %3431, %v31_v6   ;;  %v3758_v6 = vrot.slane %v450_v48, %v3650_v17 }
  0x74   :  { %v42_v21 = vpop.permute.xlu1 %41  ;;  %v38_v22 = vpop.permute.xlu0 %37 }
  0x78   :  { %v44_v28 = vpop.permute.xlu1 %43  ;;  %v40_v29 = vpop.permute.xlu0 %39 }
  0x79   :  { %v51_v31 = vsel %vm47_vm11, %v44_v28, %v38_v22  ;;  %v49_v32 = vsel %vm47_vm11, %v40_v29, %v42_v21  ;;  %v50_v33 = vsel %vm47_vm11, %v38_v22, %v40_v29  ;;  %v48_v34 = vsel %vm47_vm11, %v42_v21, %v44_v28 }
  0x7a   :  { %v84_v35 = vmul.f32 %v3661_v24, %v50_v33  ;;  %v86_v36 = vmul.f32 %v3664_v25, %v48_v34  ;;  %v83_v37 = vmul.f32 %v3667_v26, %v51_v31  ;;  %v85_v38 = vmul.f32 %v3670_v27, %v49_v32  ;;  %v3373_v31 = vld [vmem:[%s4269_s2 + $0x10] sm:$0xff] }
  0x7b   :  { %v3775_v29 = vrot.slane %v645_v9, %v3646_v16  ;;  %v1178_v34 = vadd.s32 1, %v3612_v7 }
  0x7c   :  { %v241_v40 = vpop.permute.xlu1 %240  ;;  %v239_v41 = vpop.permute.xlu0 %238  ;;  %122 = vmatprep.subr.mxu0 %v84_v35  ;;  %193 = vmatprep.subr.mxu1 %v86_v36  ;;  %v3784_v36 = vrot.slane %v645_v9, %v3652_v18 }
  0x7d   :  { %v249_v42 = vsel %vm246_vm13, %v239_v41, %v241_v40  ;;  %123 = vmatpush1.msra.mxu0 %v83_v37  ;;  %194 = vmatpush1.msra.mxu1 %v85_v38  ;;  %v3789_v38 = vrot.slane %v645_v9, %v3654_v19  ;;  %vm1179_vm2 = vcmp.ge.s32.totalorder %v1178_v34, 0  ;;  %vm1180_vm10 = vcmp.lt.s32.totalorder %v1178_v34, 16 }
  0x7e   :  { %v278_v44 = vmul.f32 %v3674_v30, %v249_v42  ;;  %3368 = vmatmul.mubr.msk.f32.vlgmr.msra.gmra.mxu0 %vm88_vm0, %v87_v39  ;;  %3369 = vmatmul.mubr.msk.f32.vlgmr.msra.gmra.mxu1 %vm88_vm0, %v87_v39  ;;  %v3792_v39 = vrot.slane %v645_v9, %v3650_v17  ;;  %vm3815_vm15 = vmand %vm1179_vm2, %vm1180_vm10 }
  0x7f   :  { %350 = vmatprep.mubr.f32.mxu0 %v4274_v4  ;;  %421 = vmatprep.mubr.f32.mxu1 %v4274_v4  ;;  %vm1182_vm2 = vmand %vm3815_vm15, %vm57_vm3 }
  0x80   :  { %v245_v49 = vpop.permute.xlu1 %244  ;;  %v243_v50 = vpop.permute.xlu0 %242  ;;  %316 = vmatprep.subr.mxu0 %v278_v44  ;;  %vm1183_vm3 = vmand %vm1182_vm2, %vm59_vm6  ;;  %vm1173_vm6 = vcmp.lt.s32.totalorder %v3641_v14, 113 }
  0x81   :  { %v250_v51 = vsel %vm246_vm13, %v245_v49, %v239_v41  ;;  %v247_v52 = vsel %vm246_vm13, %v243_v50, %v245_v49  ;;  %v248_v53 = vsel %vm246_vm13, %v241_v40, %v243_v50  ;;  %v3376_v50 = vld [vmem:[%s4269_s2 + $0x18] sm:$0xff]  ;;  %vm1374_vm10 = vmand %vm3815_vm15, %vm251_vm4 }
  0x82   :  { %v277_v54 = vmul.f32 %v3703_v43, %v250_v51  ;;  %v279_v55 = vmul.f32 %v3707_v45, %v248_v53  ;;  %v280_v56 = vmul.f32 %v3710_v46, %v247_v52  ;;  %vm1375_vm4 = vmand %vm1374_vm10, %vm253_vm8  ;;  %vm1369_vm8 = vcmp.lt.s32.totalorder %v3641_v14, 112 }
  0x84   :  { %v435_v59 = vpop.permute.xlu1 %434  ;;  %v433_v60 = vpop.permute.xlu0 %432  ;;  %317 = vmatpush1.msra.mxu0 %v277_v54  ;;  %387 = vmatprep.subr.mxu1 %v280_v56  ;;  %v988_v54 = vsel %vm987_vm7, 1.0, %v4274_v4  ;;  %vm1566_vm7 = vmand %vm3815_vm15, %vm446_vm12 }
  0x85   :  { %v443_v61 = vsel %vm440_vm9, %v433_v60, %v435_v59  ;;  %388 = vmatpush1.msra.mxu1 %v279_v55  ;;  %3371 = vmatmul.mubr.msk.f32.vlgmr.msra.gmra.mxu0 %vm88_vm0, %v3370_v58  ;;  %v3823_v55 = vrot.slane %v988_v54, %v3650_v17  ;;  %v3826_v56 = vrot.slane %v988_v54, %v3646_v16  ;;  %vm1567_vm12 = vmand %vm1566_vm7, %vm448_vm14  ;;  %vm1561_vm14 = vcmp.lt.s32.totalorder %v3641_v14, 111 }
  0x86   :  { %v473_v63 = vmul.f32 %v3740_v57, %v443_v61  ;;  %3372 = vmatmul.mubr.msk.f32.vlgmr.msra.gmra.mxu1 %vm88_vm0, %v3370_v58  ;;  %545 = vmatprep.mubr.f32.mxu0 %v4274_v4  ;;  %v3829_v58 = vrot.slane %v988_v54, %v3654_v19 }
  0x87   :  { %616 = vmatprep.mubr.f32.mxu1 %v4274_v4 }
  0x88   :  { %v439_v11 = vpop.permute.xlu1 %438  ;;  %v437_v12 = vpop.permute.xlu0 %436  ;;  %511 = vmatprep.subr.mxu0 %v473_v63 }
  0x89   :  { %v444_v13 = vsel %vm440_vm9, %v439_v11, %v433_v60  ;;  %v441_v20 = vsel %vm440_vm9, %v437_v12, %v439_v11  ;;  %v442_v21 = vsel %vm440_vm9, %v435_v59, %v437_v12  ;;  %v3379_v59 = vld [vmem:[%s4269_s2 + $0x20] sm:$0xff]  ;;  %v3841_v60 = vrot.slane %v988_v54, %v3652_v18 }
  0x8a   :  { %v472_v22 = vmul.f32 %v3750_v62, %v444_v13  ;;  %v474_v23 = vmul.f32 %v3755_v5, %v442_v21  ;;  %v475_v28 = vmul.f32 %v3758_v6, %v441_v20  ;;  %v3382_v21 = vld [vmem:[%s4269_s2 + $0x28] sm:$0xff] }
  0x8c   :  { %v630_v32 = vpop.permute.xlu1 %629  ;;  %v628_v33 = vpop.permute.xlu0 %627  ;;  %512 = vmatpush1.msra.mxu0 %v472_v22  ;;  %582 = vmatprep.subr.mxu1 %v475_v28  ;;  %v1184_v22 = vsel %vm1183_vm3, 1.0, %v4274_v4 }
  0x8d   :  { %v638_v35 = vsel %vm635_vm1, %v628_v33, %v630_v32  ;;  %583 = vmatpush1.msra.mxu1 %v474_v23  ;;  %3374 = vmatmul.mubr.msk.f32.vlgmr.msra.gmra.mxu0 %vm88_vm0, %v3373_v31  ;;  %v3873_v23 = vrot.slane %v1184_v22, %v3650_v17  ;;  %v3876_v28 = vrot.slane %v1184_v22, %v3646_v16 }
  0x8e   :  { %v668_v37 = vmul.f32 %v3775_v29, %v638_v35  ;;  %3375 = vmatmul.mubr.msk.f32.vlgmr.msra.gmra.mxu1 %vm88_vm0, %v3373_v31  ;;  %740 = vmatprep.mubr.f32.mxu0 %v4274_v4  ;;  %v3879_v31 = vrot.slane %v1184_v22, %v3654_v19 }
  0x8f   :  { %811 = vmatprep.mubr.f32.mxu1 %v4274_v4  ;;  %4291 = vst [vmem:[#allocation5_spill] sm:$0xff] %v3873_v23 }
  0x90   :  { %v634_v7 = vpop.permute.xlu1 %633  ;;  %v632_v40 = vpop.permute.xlu0 %631  ;;  %706 = vmatprep.subr.mxu0 %v668_v37 }
  0x91   :  { %v639_v41 = vsel %vm635_vm1, %v634_v7, %v628_v33  ;;  %v636_v42 = vsel %vm635_vm1, %v632_v40, %v634_v7  ;;  %v637_v44 = vsel %vm635_vm1, %v630_v32, %v632_v40  ;;  %v3887_v32 = vrot.slane %v1184_v22, %v3652_v18 }
  0x92   :  { %v667_v47 = vmul.f32 %v3784_v36, %v639_v41  ;;  %v669_v48 = vmul.f32 %v3789_v38, %v637_v44  ;;  %v670_v49 = vmul.f32 %v3792_v39, %v636_v42 }
  0x94   :  { %v976_v52 = vpop.permute.xlu1 %975  ;;  %v974_v53 = vpop.permute.xlu0 %973  ;;  %707 = vmatpush1.msra.mxu0 %v667_v47  ;;  %777 = vmatprep.subr.mxu1 %v670_v49 }
  0x95   :  { %778 = vmatpush1.msra.mxu1 %v669_v48  ;;  %3377 = vmatmul.mubr.msk.f32.vlgmr.msra.gmra.mxu0 %vm88_vm0, %v3376_v50  ;;  %v3385_v48 = vld [vmem:[%s4269_s2 + $0x30] sm:$0xff] }
  0x96   :  { %857 = vmatprep.subr.mxu0 %v3542_v3  ;;  %3378 = vmatmul.mubr.msk.f32.vlgmr.msra.gmra.mxu1 %vm88_vm0, %v3376_v50  ;;  %v984_v3 = vsel %vm981_vm5, %v974_v53, %v976_v52 }
  0x97   :  { %858 = vmatpush1.msra.mxu0 %v3528_v1  ;;  %891 = vmatprep.mubr.f32.mxu0 %v4274_v4  ;;  %v1010_v20 = vmul.f32 %v3841_v60, %v984_v3 }
  0x98   :  { %v980_v61 = vpop.permute.xlu1 %979  ;;  %v978_v63 = vpop.permute.xlu0 %977  ;;  %928 = vmatprep.subr.mxu1 %v3537_v2  ;;  %962 = vmatprep.mubr.f32.mxu1 %v4274_v4 }
  0x99   :  { %v985_v9 = vsel %vm981_vm5, %v980_v61, %v974_v53  ;;  %v982_v11 = vsel %vm981_vm5, %v978_v63, %v980_v61  ;;  %v983_v1 = vsel %vm981_vm5, %v976_v52, %v978_v63  ;;  %3380 = vmatmul.mubr.msk.f32.vlgmr.msra.gmra.mxu0 %vm88_vm0, %v3379_v59  ;;  %929 = vmatpush1.msra.mxu1 %v3523_v0  ;;  %v1376_v52 = vsel %vm1375_vm4, 1.0, %v4274_v4 }
  0x9a   :  { %v1013_v2 = vmul.f32 %v3823_v55, %v985_v9  ;;  %v1011_v12 = vmul.f32 %v3826_v56, %v983_v1  ;;  %v1012_v13 = vmul.f32 %v3829_v58, %v982_v11  ;;  %3381 = vmatmul.mubr.msk.f32.vlgmr.msra.gmra.mxu1 %vm88_vm0, %v3379_v59  ;;  %1083 = vmatprep.mubr.f32.mxu0 %v4274_v4 }
  0x9b   :  { %1154 = vmatprep.mubr.f32.mxu1 %v4274_v4  ;;  %v3913_v8 = vrot.slane %v1376_v52, %v3650_v17  ;;  %v3916_v53 = vrot.slane %v1376_v52, %v3646_v16  ;;  %v3919_v54 = vrot.slane %v1376_v52, %v3654_v19  ;;  %v3926_v59 = vrot.slane %v1376_v52, %v3652_v18 }
  0x9c   :  { %v1168_v0 = vpop.permute.xlu1 %1167  ;;  %v1166_v10 = vpop.permute.xlu0 %1165  ;;  %1049 = vmatprep.subr.mxu0 %v1011_v12  ;;  %1120 = vmatprep.subr.mxu1 %v1013_v2 }
  0x9d   :  { %1050 = vmatpush1.msra.mxu0 %v1010_v20  ;;  %1121 = vmatpush1.msra.mxu1 %v1012_v13  ;;  %v1176_v33 = vsel %vm1173_vm6, %v1166_v10, %v1168_v0  ;;  %4292 = vst [vmem:[#allocation6_spill] sm:$0xff] %v3913_v8  ;;  %4293 = vst [vmem:[#allocation7_spill] sm:$0xff] %v3916_v53  ;;  %v3388_v20 = vld [vmem:[%s4269_s2 + $0x38] sm:$0xff] }
  0x9e   :  { %3383 = vmatmul.mubr.msk.f32.vlgmr.msra.gmra.mxu0 %vm88_vm0, %v3382_v21  ;;  %3384 = vmatmul.mubr.msk.f32.vlgmr.msra.gmra.mxu1 %vm88_vm0, %v3382_v21  ;;  %v1206_v47 = vmul.f32 %v3887_v32, %v1176_v33  ;;  %4294 = vst [vmem:[#allocation8_spill] sm:$0xff] %v3919_v54  ;;  %4295 = vst [vmem:[#allocation9_spill] sm:$0xff] %v3926_v59 }
  0x9f   :  { %1279 = vmatprep.mubr.f32.mxu0 %v4274_v4  ;;  %1350 = vmatprep.mubr.f32.mxu1 %v4274_v4 }
  0xa0   :  { %v1172_v34 = vpop.permute.xlu1 %1171  ;;  %v1170_v35 = vpop.permute.xlu0 %1169 }
  0xa1   :  { %v1177_v37 = vsel %vm1173_vm6, %v1172_v34, %v1166_v10  ;;  %v1174_v7 = vsel %vm1173_vm6, %v1170_v35, %v1172_v34  ;;  %v1175_v40 = vsel %vm1173_vm6, %v1168_v0, %v1170_v35  ;;  %v1568_v10 = vsel %vm1567_vm12, 1.0, %v4274_v4 }
  0xa2   :  { %v1209_v41 = vmul.f32 %v3873_v23, %v1177_v37  ;;  %v1207_v42 = vmul.f32 %v3876_v28, %v1175_v40  ;;  %v1208_v44 = vmul.f32 %v3879_v31, %v1174_v7  ;;  %v3952_v15 = vrot.slane %v1568_v10, %v3650_v17 }
  0xa3   :  { %v3955_v22 = vrot.slane %v1568_v10, %v3646_v16  ;;  %v3958_v33 = vrot.slane %v1568_v10, %v3654_v19  ;;  %v3961_v34 = vrot.slane %v1568_v10, %v3652_v18 }
  0xa4   :  { %v1364_v49 = vpop.permute.xlu1 %1363  ;;  %v1362_v50 = vpop.permute.xlu0 %1361  ;;  %1245 = vmatprep.subr.mxu0 %v1207_v42  ;;  %1316 = vmatprep.subr.mxu1 %v1209_v41  ;;  %4296 = vst [vmem:[#allocation10_spill] sm:$0xff] %v3952_v15 }
  0xa5   :  { %1246 = vmatpush1.msra.mxu0 %v1206_v47  ;;  %1317 = vmatpush1.msra.mxu1 %v1208_v44  ;;  %v1372_v3 = vsel %vm1369_vm8, %v1362_v50, %v1364_v49  ;;  %4297 = vst [vmem:[#allocation11_spill] sm:$0xff] %v3955_v22  ;;  %4298 = vst [vmem:[#allocation12_spill] sm:$0xff] %v3958_v33  ;;  %v3391_v44 = vld [vmem:[%s4269_s2 + $0x40] sm:$0xff] }
  0xa6   :  { %3386 = vmatmul.mubr.msk.f32.vlgmr.msra.gmra.mxu0 %vm88_vm0, %v3385_v48  ;;  %3387 = vmatmul.mubr.msk.f32.vlgmr.msra.gmra.mxu1 %vm88_vm0, %v3385_v48  ;;  %v1398_v13 = vmul.f32 %v3926_v59, %v1372_v3  ;;  %4299 = vst [vmem:[#allocation13_spill] sm:$0xff] %v3961_v34 }
  0xa7   :  { %1471 = vmatprep.mubr.f32.mxu0 %v4274_v4  ;;  %1542 = vmatprep.mubr.f32.mxu1 %v4274_v4 }
  0xa8   :  { %v1368_v61 = vpop.permute.xlu1 %1367  ;;  %v1366_v63 = vpop.permute.xlu0 %1365 }
  0xa9   :  { %v1373_v9 = vsel %vm1369_vm8, %v1368_v61, %v1362_v50  ;;  %v1370_v11 = vsel %vm1369_vm8, %v1366_v63, %v1368_v61  ;;  %v1371_v51 = vsel %vm1369_vm8, %v1364_v49, %v1366_v63 }
  0xaa   :  { %v1401_v1 = vmul.f32 %v3913_v8, %v1373_v9  ;;  %v1399_v2 = vmul.f32 %v3916_v53, %v1371_v51  ;;  %v1400_v12 = vmul.f32 %v3919_v54, %v1370_v11 }
  0xac   :  { %v1556_v21 = vpop.permute.xlu1 %1555  ;;  %v1554_v0 = vpop.permute.xlu0 %1553  ;;  %1437 = vmatprep.subr.mxu0 %v1399_v2  ;;  %1508 = vmatprep.subr.mxu1 %v1401_v1 }
  0xad   :  { %1438 = vmatpush1.msra.mxu0 %v1398_v13  ;;  %1509 = vmatpush1.msra.mxu1 %v1400_v12  ;;  %v1564_v35 = vsel %vm1561_vm14, %v1554_v0, %v1556_v21 }
  0xae   :  { %3389 = vmatmul.mubr.msk.f32.vlgmr.msra.gmra.mxu0 %vm88_vm0, %v3388_v20  ;;  %3390 = vmatmul.mubr.msk.f32.vlgmr.msra.gmra.mxu1 %vm88_vm0, %v3388_v20  ;;  %v1590_v42 = vmul.f32 %v3961_v34, %v1564_v35 }
  0xaf   :  { %1663 = vmatprep.mubr.f32.mxu0 %v4274_v4  ;;  %1734 = vmatprep.mubr.f32.mxu1 %v4274_v4 }
  0xb0   :  { %v1560_v37 = vpop.permute.xlu1 %1559  ;;  %v1558_v7 = vpop.permute.xlu0 %1557 }
  0xb1   :  { %v1565_v17 = vsel %vm1561_vm14, %v1560_v37, %v1554_v0  ;;  %v1562_v16 = vsel %vm1561_vm14, %v1558_v7, %v1560_v37  ;;  %v1563_v19 = vsel %vm1561_vm14, %v1556_v21, %v1558_v7 }
  0xb2   :  { %v1593_v18 = vmul.f32 %v3952_v15, %v1565_v17  ;;  %v1591_v40 = vmul.f32 %v3955_v22, %v1563_v19  ;;  %v1592_v41 = vmul.f32 %v3958_v33, %v1562_v16 }
  0xb4   :  { %1629 = vmatprep.subr.mxu0 %v1591_v40  ;;  %1700 = vmatprep.subr.mxu1 %v1593_v18 }
  0xb5   :  { %1630 = vmatpush1.msra.mxu0 %v1590_v42  ;;  %1701 = vmatpush1.msra.mxu1 %v1592_v41 }
  0xb6   :  { %3392 = vmatmul.mubr.msk.f32.vlgmr.msra.gmra.mxu0 %vm88_vm0, %v3391_v44  ;;  %3393 = vmatmul.mubr.msk.f32.vlgmr.msra.gmra.mxu1 %vm88_vm0, %v3391_v44 }
  0xb7   :  { %1835 = vmatprep.mubr.f32.mxu0 %v4274_v4  ;;  %1906 = vmatprep.mubr.f32.mxu1 %v4274_v4 }
  0xbd   :  { %v35_v21 = vpop.permute.xlu0 %34 }
 0x13e   :  { %v158_v47 = vpop.f32.mrf.mxu0  ;;  %v229_v48 = vpop.f32.mrf.mxu1 }
 0x13f   :  { %v236_v10 = vadd.f32 %v229_v48, %v35_v21  ;;  %v234_v37 = vadd.f32 %v158_v47, %v35_v21 }
 0x140   :  { %v160_v49 = vpop.f32.mrf.mxu0  ;;  %v231_v50 = vpop.f32.mrf.mxu1 }
 0x141   :  { %v235_v19 = vadd.f32 %v160_v49, %v35_v21  ;;  %v237_v42 = vadd.f32 %v231_v50, %v35_v21 }
 0x145   :  { %v352_v52 = vpop.f32.mrf.mxu0 }
 0x146   :  { %v423_v3 = vpop.f32.mrf.mxu1  ;;  %v428_v18 = vadd.f32 %v352_v52, %v234_v37 }
 0x147   :  { %v354_v61 = vpop.f32.mrf.mxu0  ;;  %v430_v17 = vadd.f32 %v423_v3, %v236_v10 }
 0x148   :  { %v425_v63 = vpop.f32.mrf.mxu1  ;;  %v429_v15 = vadd.f32 %v354_v61, %v235_v19 }
 0x149   :  { %v431_v22 = vadd.f32 %v425_v63, %v237_v42 }
 0x14d   :  { %v547_v9 = vpop.f32.mrf.mxu0 }
 0x14e   :  { %v618_v11 = vpop.f32.mrf.mxu1  ;;  %v623_v4 = vadd.f32 %v547_v9, %v428_v18 }
 0x14f   :  { %v549_v51 = vpop.f32.mrf.mxu0  ;;  %v625_v41 = vadd.f32 %v618_v11, %v430_v17 }
 0x150   :  { %v620_v1 = vpop.f32.mrf.mxu1  ;;  %v624_v53 = vadd.f32 %v549_v51, %v429_v15 }
 0x151   :  { %v626_v47 = vadd.f32 %v620_v1, %v431_v22 }
 0x155   :  { %v742_v2 = vpop.f32.mrf.mxu0 }
 0x156   :  { %v813_v12 = vpop.f32.mrf.mxu1  ;;  %v818_v54 = vadd.f32 %v742_v2, %v623_v4 }
 0x157   :  { %v744_v13 = vpop.f32.mrf.mxu0  ;;  %v820_v34 = vadd.f32 %v813_v12, %v625_v41 }
 0x158   :  { %v815_v20 = vpop.f32.mrf.mxu1  ;;  %v819_v3 = vadd.f32 %v744_v13, %v624_v53 }
 0x159   :  { %v893_v35 = vpop.f32.mrf.mxu0  ;;  %v821_v37 = vadd.f32 %v815_v20, %v626_v47 }
 0x15a   :  { %v964_v0 = vpop.f32.mrf.mxu1  ;;  %v969_v10 = vadd.f32 %v893_v35, %v818_v54 }
 0x15b   :  { %v895_v16 = vpop.f32.mrf.mxu0  ;;  %v971_v23 = vadd.f32 %v964_v0, %v820_v34 }
 0x15c   :  { %v966_v7 = vpop.f32.mrf.mxu1  ;;  %v970_v9 = vadd.f32 %v895_v16, %v819_v3 }
 0x15d   :  { %v972_v17 = vadd.f32 %v966_v7, %v821_v37  ;;  %v1745_v7 = vld [vmem:[%s4272_s5] sm:$0xff] }
 0x15e   :  { %v1156_v40 = vpop.f32.mrf.mxu1  ;;  %v1085_v44 = vpop.f32.mrf.mxu0 }
 0x15f   :  { %v1163_v11 = vadd.f32 %v1156_v40, %v971_v23  ;;  %v1161_v61 = vadd.f32 %v1085_v44, %v969_v10 }
 0x160   :  { %v1158_v33 = vpop.f32.mrf.mxu1  ;;  %v1087_v8 = vpop.f32.mrf.mxu0 }
 0x161   :  { %v1162_v15 = vadd.f32 %v1087_v8, %v970_v9  ;;  %v1164_v53 = vadd.f32 %v1158_v33, %v972_v17 }
 0x166   :  { %v1281_v48 = vpop.f32.mrf.mxu0  ;;  %v1352_v59 = vpop.f32.mrf.mxu1 }
 0x167   :  { %v1357_v63 = vadd.f32 %v1281_v48, %v1161_v61  ;;  %v1359_v12 = vadd.f32 %v1352_v59, %v1163_v11 }
 0x168   :  { %v1283_v49 = vpop.f32.mrf.mxu0  ;;  %v1354_v52 = vpop.f32.mrf.mxu1 }
 0x169   :  { %v1358_v54 = vadd.f32 %v1283_v49, %v1162_v15  ;;  %v1360_v59 = vadd.f32 %v1354_v52, %v1164_v53 }
 0x16e   :  { %v1473_v50 = vpop.f32.mrf.mxu0  ;;  %v1544_v21 = vpop.f32.mrf.mxu1 }
 0x16f   :  { %v1549_v51 = vadd.f32 %v1473_v50, %v1357_v63  ;;  %v1551_v2 = vadd.f32 %v1544_v21, %v1359_v12 }
 0x170   :  { %v1475_v19 = vpop.f32.mrf.mxu0  ;;  %v1546_v4 = vpop.f32.mrf.mxu1 }
 0x171   :  { %v1550_v20 = vadd.f32 %v1475_v19, %v1358_v54  ;;  %v1552_v35 = vadd.f32 %v1546_v4, %v1360_v59  ;;  %v3396_v4 = vld [vmem:[%s4271_s4 + $0x8] sm:$0xff] }
 0x176   :  { %v1665_v22 = vpop.f32.mrf.mxu0  ;;  %v1736_v34 = vpop.f32.mrf.mxu1 }
 0x177   :  { %v3984_v1 = vadd.f32 %v1665_v22, %v1549_v51  ;;  %v3986_v13 = vadd.f32 %v1736_v34, %v1551_v2 }
 0x178   :  { %v1667_v23 = vpop.f32.mrf.mxu0  ;;  %v1738_v0 = vpop.f32.mrf.mxu1 }
 0x179   :  { %1755 = vrot.lane.b32.xlu0 %v3986_v13, %s3474_s25  ;;  %1751 = vrot.lane.b32.xlu1 %v3984_v1, %s3474_s25  ;;  %v3992_v8 = vadd.f32 %v1667_v23, %v1550_v20  ;;  %v3998_v33 = vadd.f32 %v1738_v0, %v1552_v35  ;;  %v3399_v20 = vld [vmem:[%s4271_s4 + $0x10] sm:$0xff] }
 0x17d   :  { %1917 = vrot.lane.b32.xlu0 %v3984_v1, %s3476_s30  ;;  %1753 = vrot.lane.b32.xlu1 %v3992_v8, %s3474_s25 }
 0x181   :  { %1921 = vrot.lane.b32.xlu0 %v3986_v13, %s3476_s30  ;;  %1757 = vrot.lane.b32.xlu1 %v3998_v33, %s3474_s25  ;;  %s3452_s25 = scalar_lea.vmem %s3360_s17, 512 }
 0x182   :  { %p3453_p0 = scmp.ne.s32.totalorder %s3360_s17, %s3452_s25  ;;  %p3458_p2 = scmp.lt.s32.totalorder %s3452_s25, %s3452_s25 }
 0x184   :  { %p3459_p3 = por %p3458_p2, %p3457_p1 }
 0x185   :  { %2084 = vrot.lane.b32.xlu0 %v3984_v1, %s3477_s7  ;;  %1919 = vrot.lane.b32.xlu1 %v3992_v8, %s3476_s30 }
 0x186   :  { %p3460_p4 = pnand %p3459_p3, %p3453_p0 }
 0x189   :  { %2088 = vrot.lane.b32.xlu0 %v3986_v13, %s3477_s7  ;;  %1923 = vrot.lane.b32.xlu1 %v3998_v33, %s3476_s30 }
 0x18d   :  { %2251 = vrot.lane.b32.xlu0 %v3984_v1, %s3478_s8  ;;  %2086 = vrot.lane.b32.xlu1 %v3992_v8, %s3477_s7 }
 0x191   :  { %2255 = vrot.lane.b32.xlu0 %v3986_v13, %s3478_s8  ;;  %2090 = vrot.lane.b32.xlu1 %v3998_v33, %s3477_s7 }
 0x195   :  { %2569 = vrot.lane.b32.xlu0 %v3984_v1, %s3479_s9  ;;  %2253 = vrot.lane.b32.xlu1 %v3992_v8, %s3478_s8 }
 0x199   :  { %2573 = vrot.lane.b32.xlu0 %v3986_v13, %s3479_s9  ;;  %2257 = vrot.lane.b32.xlu1 %v3998_v33, %s3478_s8 }
 0x19d   :  { %2736 = vrot.lane.b32.xlu0 %v3984_v1, %s3480_s10  ;;  %2571 = vrot.lane.b32.xlu1 %v3992_v8, %s3479_s9 }
 0x1a1   :  { %2740 = vrot.lane.b32.xlu0 %v3986_v13, %s3480_s10  ;;  %2575 = vrot.lane.b32.xlu1 %v3998_v33, %s3479_s9 }
 0x1a5   :  { %2903 = vrot.lane.b32.xlu0 %v3984_v1, %s3481_s11  ;;  %2738 = vrot.lane.b32.xlu1 %v3992_v8, %s3480_s10 }
 0x1a9   :  { %2907 = vrot.lane.b32.xlu0 %v3986_v13, %s3481_s11  ;;  %2742 = vrot.lane.b32.xlu1 %v3998_v33, %s3480_s10 }
 0x1ad   :  { %3070 = vrot.lane.b32.xlu0 %v3984_v1, %s3483_s12  ;;  %2905 = vrot.lane.b32.xlu1 %v3992_v8, %s3481_s11 }
 0x1b1   :  { %3074 = vrot.lane.b32.xlu0 %v3986_v13, %s3483_s12  ;;  %2909 = vrot.lane.b32.xlu1 %v3998_v33, %s3481_s11 }
 0x1b5   :  { %1748 = vperm.xlu0 %3431, %v1745_v7   ;;  %3072 = vrot.lane.b32.xlu1 %v3992_v8, %s3483_s12 }
 0x1b9   :  { %3076 = vrot.lane.b32.xlu1 %v3998_v33, %s3483_s12 }
 0x1eb   :  { %v1756_v16 = vpop.permute.xlu0 %1755  ;;  %v1752_v18 = vpop.permute.xlu1 %1751 }
 0x1ef   :  { %v1918_v40 = vpop.permute.xlu0 %1917  ;;  %v1754_v41 = vpop.permute.xlu1 %1753 }
 0x1f0   :  { %v1761_v42 = vsel %vm47_vm11, %v1752_v18, %v1754_v41  ;;  %v1760_v48 = vsel %vm47_vm11, %v1754_v41, %v1756_v16 }
 0x1f1   :  { %v1764_v44 = vmul.f32 %v1761_v42, %v3661_v24  ;;  %v1767_v24 = vld [vmem:[%s4271_s4] sm:$0xff]  ;;  %v1765_v11 = vmul.f32 %v1760_v48, %v3670_v27  ;;  %v3402_v42 = vld [vmem:[%s4271_s4 + $0x18] sm:$0xff] }
 0x1f3   :  { %v1922_v47 = vpop.permute.xlu0 %1921  ;;  %1801 = vmatprep.subr.mxu0 %v1764_v44  ;;  %v1758_v3 = vpop.permute.xlu1 %1757 }
 0x1f4   :  { %v1759_v10 = vsel %vm47_vm11, %v1756_v16, %v1758_v3  ;;  %v1762_v49 = vsel %vm47_vm11, %v1758_v3, %v1752_v18 }
 0x1f5   :  { %v1763_v52 = vmul.f32 %v1762_v49, %v3667_v26  ;;  %v1766_v37 = vmul.f32 %v1759_v10, %v3664_v25  ;;  %v4300_v25 = vmov 0.0  }
 0x1f7   :  { %v2085_v50 = vpop.permute.xlu0 %2084  ;;  %1802 = vmatpush1.msra.mxu0 %v1763_v52  ;;  %1872 = vmatprep.subr.mxu1 %v1766_v37  ;;  %v1920_v21 = vpop.permute.xlu1 %1919 }
 0x1f8   :  { %v1927_v9 = vsel %vm246_vm13, %v1918_v40, %v1920_v21  ;;  %3394 = vmatmul.mubr.msk.f32.vlgmr.msra.gmra.mxu0 %vm88_vm0, %v1767_v24  ;;  %1873 = vmatpush1.msra.mxu1 %v1765_v11  ;;  %v1926_v27 = vsel %vm246_vm13, %v1920_v21, %v1922_v47 }
 0x1f9   :  { %v1930_v26 = vmul.f32 %v1927_v9, %v3674_v30  ;;  %3395 = vmatmul.mubr.msk.f32.vlgmr.msra.gmra.mxu1 %vm88_vm0, %v1767_v24  ;;  %2002 = vmatprep.mubr.f32.mxu0 %v4300_v25  ;;  %v1931_v15 = vmul.f32 %v1926_v27, %v3707_v45  ;;  %v4301_v27 = vld [vmem:[#allocation5_spill] sm:$0xff] }
 0x1fa   :  { %2073 = vmatprep.mubr.f32.mxu1 %v4300_v25 }
 0x1fb   :  { %v2089_v61 = vpop.permute.xlu0 %2088  ;;  %1968 = vmatprep.subr.mxu0 %v1930_v26  ;;  %v1924_v17 = vpop.permute.xlu1 %1923 }
 0x1fc   :  { %v1925_v63 = vsel %vm246_vm13, %v1922_v47, %v1924_v17  ;;  %v1928_v12 = vsel %vm246_vm13, %v1924_v17, %v1918_v40 }
 0x1fd   :  { %v1929_v30 = vmul.f32 %v1928_v12, %v3703_v43  ;;  %v1932_v19 = vmul.f32 %v1925_v63, %v3710_v46 }
 0x1ff   :  { %v2252_v51 = vpop.permute.xlu0 %2251  ;;  %1969 = vmatpush1.msra.mxu0 %v1929_v30  ;;  %2039 = vmatprep.subr.mxu1 %v1932_v19  ;;  %v2087_v2 = vpop.permute.xlu1 %2086  ;;  %v4302_v19 = vld [vmem:[#allocation9_spill] sm:$0xff] }
 0x200   :  { %v2094_v22 = vsel %vm440_vm9, %v2085_v50, %v2087_v2  ;;  %3397 = vmatmul.mubr.msk.f32.vlgmr.msra.gmra.mxu0 %vm88_vm0, %v3396_v4  ;;  %2040 = vmatpush1.msra.mxu1 %v1931_v15  ;;  %v2093_v45 = vsel %vm440_vm9, %v2087_v2, %v2089_v61  ;;  %v4303_v15 = vld [vmem:[#allocation7_spill] sm:$0xff] }
 0x201   :  { %v2097_v43 = vmul.f32 %v2094_v22, %v3740_v57  ;;  %3398 = vmatmul.mubr.msk.f32.vlgmr.msra.gmra.mxu1 %vm88_vm0, %v3396_v4  ;;  %2169 = vmatprep.mubr.f32.mxu0 %v4300_v25  ;;  %v2098_v59 = vmul.f32 %v2093_v45, %v3755_v5  ;;  %v4304_v45 = vld [vmem:[#allocation8_spill] sm:$0xff] }
 0x202   :  { %2240 = vmatprep.mubr.f32.mxu1 %v4300_v25 }
 0x203   :  { %v2256_v46 = vpop.permute.xlu0 %2255  ;;  %2135 = vmatprep.subr.mxu0 %v2097_v43  ;;  %v2091_v34 = vpop.permute.xlu1 %2090 }
 0x204   :  { %v2092_v53 = vsel %vm440_vm9, %v2089_v61, %v2091_v34  ;;  %v2095_v54 = vsel %vm440_vm9, %v2091_v34, %v2085_v50  ;;  %v3411_v50 = vld [vmem:[%s4271_s4 + $0x30] sm:$0xff]  ;;  %v4305_v34 = vld [vmem:[#allocation6_spill] sm:$0xff] }
 0x205   :  { %v2096_v57 = vmul.f32 %v2095_v54, %v3750_v62  ;;  %v2099_v23 = vmul.f32 %v2092_v53, %v3758_v6 }
 0x207   :  { %v2570_v0 = vpop.permute.xlu0 %2569  ;;  %2136 = vmatpush1.msra.mxu0 %v2096_v57  ;;  %2206 = vmatprep.subr.mxu1 %v2099_v23  ;;  %v2254_v35 = vpop.permute.xlu1 %2253 }
 0x208   :  { %v2261_v7 = vsel %vm635_vm1, %v2252_v51, %v2254_v35  ;;  %3400 = vmatmul.mubr.msk.f32.vlgmr.msra.gmra.mxu0 %vm88_vm0, %v3399_v20  ;;  %2207 = vmatpush1.msra.mxu1 %v2098_v59  ;;  %v2260_v5 = vsel %vm635_vm1, %v2254_v35, %v2256_v46  ;;  %v4306_v59 = vld [vmem:[#allocation13_spill] sm:$0xff]  ;;  %v4307_v35 = vld [vmem:[#allocation11_spill] sm:$0xff] }
 0x209   :  { %v2264_v62 = vmul.f32 %v2261_v7, %v3775_v29  ;;  %3401 = vmatmul.mubr.msk.f32.vlgmr.msra.gmra.mxu1 %vm88_vm0, %v3399_v20  ;;  %2336 = vmatprep.mubr.f32.mxu0 %v4300_v25  ;;  %v2265_v44 = vmul.f32 %v2260_v5, %v3789_v38  ;;  %v3405_v38 = vld [vmem:[%s4271_s4 + $0x20] sm:$0xff] }
 0x20a   :  { %2407 = vmatprep.mubr.f32.mxu1 %v4300_v25 }
 0x20b   :  { %v2574_v6 = vpop.permute.xlu0 %2573  ;;  %2302 = vmatprep.subr.mxu0 %v2264_v62  ;;  %v2258_v16 = vpop.permute.xlu1 %2257  ;;  %v3417_v62 = vld [vmem:[%s4271_s4 + $0x40] sm:$0xff] }
 0x20c   :  { %v2259_v18 = vsel %vm635_vm1, %v2256_v46, %v2258_v16  ;;  %v2262_v40 = vsel %vm635_vm1, %v2258_v16, %v2252_v51  ;;  %v3414_v51 = vld [vmem:[%s4271_s4 + $0x38] sm:$0xff] }
 0x20d   :  { %v2263_v29 = vmul.f32 %v2262_v40, %v3784_v36  ;;  %v2266_v41 = vmul.f32 %v2259_v18, %v3792_v39  ;;  %v4308_v18 = vld [vmem:[#allocation12_spill] sm:$0xff] }
 0x20f   :  { %v2737_v48 = vpop.permute.xlu0 %2736  ;;  %2303 = vmatpush1.msra.mxu0 %v2263_v29  ;;  %2373 = vmatprep.subr.mxu1 %v2266_v41  ;;  %v2572_v47 = vpop.permute.xlu1 %2571  ;;  %v4309_v29 = vld [vmem:[#allocation10_spill] sm:$0xff] }
 0x210   :  { %v2578_v3 = vsel %vm981_vm5, %v2572_v47, %v2574_v6  ;;  %v2579_v10 = vsel %vm981_vm5, %v2570_v0, %v2572_v47  ;;  %3403 = vmatmul.mubr.msk.f32.vlgmr.msra.gmra.mxu0 %vm88_vm0, %v3402_v42  ;;  %2374 = vmatpush1.msra.mxu1 %v2265_v44 }
 0x211   :  { %v2581_v36 = vmul.f32 %v2579_v10, %v3841_v60  ;;  %v2582_v39 = vmul.f32 %v2578_v3, %v3826_v56  ;;  %2453 = vmatprep.subr.mxu0 %v3992_v8  ;;  %3404 = vmatmul.mubr.msk.f32.vlgmr.msra.gmra.mxu1 %vm88_vm0, %v3402_v42 }
 0x212   :  { %2454 = vmatpush1.msra.mxu0 %v3984_v1  ;;  %2524 = vmatprep.subr.mxu1 %v3998_v33 }
 0x213   :  { %2525 = vmatpush1.msra.mxu1 %v3986_v13  ;;  %v2741_v49 = vpop.permute.xlu0 %2740  ;;  %2487 = vmatprep.mubr.f32.mxu0 %v4300_v25  ;;  %v2576_v60 = vpop.permute.xlu1 %2575  ;;  %v3408_v13 = vld [vmem:[%s4271_s4 + $0x28] sm:$0xff] }
 0x214   :  { %2620 = vmatprep.subr.mxu0 %v2582_v39  ;;  %v2577_v56 = vsel %vm981_vm5, %v2574_v6, %v2576_v60  ;;  %v2580_v8 = vsel %vm981_vm5, %v2576_v60, %v2570_v0  ;;  %3406 = vmatmul.mubr.msk.f32.vlgmr.msra.gmra.mxu0 %vm88_vm0, %v3405_v38 }
 0x215   :  { %v2583_v52 = vmul.f32 %v2577_v56, %v3829_v58  ;;  %v2584_v1 = vmul.f32 %v2580_v8, %v3823_v55  ;;  %2558 = vmatprep.mubr.f32.mxu1 %v4300_v25  ;;  %2621 = vmatpush1.msra.mxu0 %v2581_v36 }
 0x216   :  { %3407 = vmatmul.mubr.msk.f32.vlgmr.msra.gmra.mxu1 %vm88_vm0, %v3405_v38  ;;  %2654 = vmatprep.mubr.f32.mxu0 %v4300_v25 }
 0x217   :  { %v2904_v33 = vpop.permute.xlu0 %2903  ;;  %2691 = vmatprep.subr.mxu1 %v2584_v1  ;;  %v2739_v37 = vpop.permute.xlu1 %2738  ;;  %2725 = vmatprep.mubr.f32.mxu1 %v4300_v25 }
 0x218   :  { %v2745_v58 = vsel %vm1173_vm6, %v2739_v37, %v2741_v49  ;;  %v2746_v55 = vsel %vm1173_vm6, %v2737_v48, %v2739_v37  ;;  %3409 = vmatmul.mubr.msk.f32.vlgmr.msra.gmra.mxu0 %vm88_vm0, %v3408_v13  ;;  %2692 = vmatpush1.msra.mxu1 %v2583_v52 }
 0x219   :  { %v2748_v24 = vmul.f32 %v2746_v55, %v3887_v32  ;;  %v2749_v11 = vmul.f32 %v2745_v58, %v3876_v28  ;;  %2821 = vmatprep.mubr.f32.mxu0 %v4300_v25 }
 0x21a   :  { %3410 = vmatmul.mubr.msk.f32.vlgmr.msra.gmra.mxu1 %vm88_vm0, %v3408_v13 }
 0x21b   :  { %v2908_v21 = vpop.permute.xlu0 %2907  ;;  %2787 = vmatprep.subr.mxu0 %v2749_v11  ;;  %v2743_v9 = vpop.permute.xlu1 %2742  ;;  %2892 = vmatprep.mubr.f32.mxu1 %v4300_v25 }
 0x21c   :  { %v2744_v26 = vsel %vm1173_vm6, %v2741_v49, %v2743_v9  ;;  %v2747_v32 = vsel %vm1173_vm6, %v2743_v9, %v2737_v48  ;;  %2788 = vmatpush1.msra.mxu0 %v2748_v24 }
 0x21d   :  { %v2750_v28 = vmul.f32 %v2744_v26, %v3879_v31  ;;  %v2751_v61 = vmul.f32 %v2747_v32, %v4301_v27  ;;  %3412 = vmatmul.mubr.msk.f32.vlgmr.msra.gmra.mxu0 %vm88_vm0, %v3411_v50 }
 0x21e   :  { %2988 = vmatprep.mubr.f32.mxu0 %v4300_v25 }
 0x21f   :  { %2858 = vmatprep.subr.mxu1 %v2751_v61  ;;  %v2906_v17 = vpop.permute.xlu1 %2905  ;;  %v3071_v30 = vpop.permute.xlu0 %3070 }
 0x220   :  { %v2912_v63 = vsel %vm1369_vm8, %v2906_v17, %v2908_v21  ;;  %v2913_v12 = vsel %vm1369_vm8, %v2904_v33, %v2906_v17  ;;  %2859 = vmatpush1.msra.mxu1 %v2750_v28 }
 0x221   :  { %v2915_v4 = vmul.f32 %v2913_v12, %v4302_v19  ;;  %v2916_v31 = vmul.f32 %v2912_v63, %v4303_v15  ;;  %3413 = vmatmul.mubr.msk.f32.vlgmr.msra.gmra.mxu1 %vm88_vm0, %v3411_v50 }
 0x222   :  { %3059 = vmatprep.mubr.f32.mxu1 %v4300_v25 }
 0x223   :  { %2954 = vmatprep.subr.mxu0 %v2916_v31  ;;  %v2910_v2 = vpop.permute.xlu1 %2909  ;;  %v3075_v54 = vpop.permute.xlu0 %3074 }
 0x224   :  { %v2911_v22 = vsel %vm1369_vm8, %v2908_v21, %v2910_v2  ;;  %v2914_v43 = vsel %vm1369_vm8, %v2910_v2, %v2904_v33  ;;  %2955 = vmatpush1.msra.mxu0 %v2915_v4 }
 0x225   :  { %v2917_v46 = vmul.f32 %v2911_v22, %v4304_v45  ;;  %v2918_v53 = vmul.f32 %v2914_v43, %v4305_v34  ;;  %3415 = vmatmul.mubr.msk.f32.vlgmr.msra.gmra.mxu0 %vm88_vm0, %v3414_v51 }
 0x226   :  { %3155 = vmatprep.mubr.f32.mxu0 %v4300_v25 }
 0x227   :  { %3025 = vmatprep.subr.mxu1 %v2918_v53  ;;  %v3073_v57 = vpop.permute.xlu1 %3072 }
 0x228   :  { %v3079_v23 = vsel %vm1561_vm14, %v3073_v57, %v3075_v54  ;;  %v3080_v20 = vsel %vm1561_vm14, %v3071_v30, %v3073_v57  ;;  %3026 = vmatpush1.msra.mxu1 %v2917_v46 }
 0x229   :  { %v3082_v0 = vmul.f32 %v3080_v20, %v4306_v59  ;;  %v3083_v7 = vmul.f32 %v3079_v23, %v4307_v35  ;;  %3416 = vmatmul.mubr.msk.f32.vlgmr.msra.gmra.mxu1 %vm88_vm0, %v3414_v51 }
 0x22a   :  { %3226 = vmatprep.mubr.f32.mxu1 %v4300_v25 }
 0x22b   :  { %3121 = vmatprep.subr.mxu0 %v3083_v7  ;;  %v3077_v5 = vpop.permute.xlu1 %3076 }
 0x22c   :  { %v3078_v6 = vsel %vm1561_vm14, %v3075_v54, %v3077_v5  ;;  %v3081_v16 = vsel %vm1561_vm14, %v3077_v5, %v3071_v30  ;;  %3122 = vmatpush1.msra.mxu0 %v3082_v0 }
 0x22d   :  { %v3084_v40 = vmul.f32 %v3078_v6, %v4308_v18  ;;  %v3085_v41 = vmul.f32 %v3081_v16, %v4309_v29  ;;  %3418 = vmatmul.mubr.msk.f32.vlgmr.msra.gmra.mxu0 %vm88_vm0, %v3417_v62 }
 0x22f   :  { %3192 = vmatprep.subr.mxu1 %v3085_v41 }
 0x230   :  { %3193 = vmatpush1.msra.mxu1 %v3084_v40  ;;  %v1749_v55 = vpop.permute.xlu0 %1748 }
 0x231   :  { %3419 = vmatmul.mubr.msk.f32.vlgmr.msra.gmra.mxu1 %vm88_vm0, %v3417_v62 }
 0x2b8   :  { %v1837_v25 = vpop.f32.mrf.mxu0 }
 0x2b9   :  { %v1908_v42 = vpop.f32.mrf.mxu1  ;;  %v1913_v11 = vadd.f32 %v1837_v25, %v1749_v55 }
 0x2ba   :  { %v1839_v44 = vpop.f32.mrf.mxu0  ;;  %v1915_v27 = vadd.f32 %v1908_v42, %v1749_v55 }
 0x2bb   :  { %v1910_v48 = vpop.f32.mrf.mxu1  ;;  %v1914_v21 = vadd.f32 %v1839_v44, %v1749_v55 }
 0x2bc   :  { %v1916_v12 = vadd.f32 %v1910_v48, %v1749_v55 }
 0x2c0   :  { %v2004_v47 = vpop.f32.mrf.mxu0 }
 0x2c1   :  { %v2075_v3 = vpop.f32.mrf.mxu1  ;;  %v2080_v9 = vadd.f32 %v2004_v47, %v1913_v11 }
 0x2c2   :  { %v2006_v10 = vpop.f32.mrf.mxu0  ;;  %v2082_v30 = vadd.f32 %v2075_v3, %v1915_v27 }
 0x2c3   :  { %v2077_v14 = vpop.f32.mrf.mxu1  ;;  %v2081_v32 = vadd.f32 %v2006_v10, %v1914_v21 }
 0x2c4   :  { %v2083_v51 = vadd.f32 %v2077_v14, %v1916_v12 }
 0x2c8   :  { %v2171_v36 = vpop.f32.mrf.mxu0 }
 0x2c9   :  { %v2242_v39 = vpop.f32.mrf.mxu1  ;;  %v2247_v28 = vadd.f32 %v2171_v36, %v2080_v9 }
 0x2ca   :  { %v2173_v38 = vpop.f32.mrf.mxu0  ;;  %v2249_v2 = vadd.f32 %v2242_v39, %v2082_v30 }
 0x2cb   :  { %v2244_v49 = vpop.f32.mrf.mxu1  ;;  %v2248_v17 = vadd.f32 %v2173_v38, %v2081_v32 }
 0x2cc   :  { %v2250_v46 = vadd.f32 %v2244_v49, %v2083_v51 }
 0x2d0   :  { %v2338_v60 = vpop.f32.mrf.mxu0 }
 0x2d1   :  { %v2409_v56 = vpop.f32.mrf.mxu1  ;;  %v2414_v63 = vadd.f32 %v2338_v60, %v2247_v28 }
 0x2d2   :  { %v2340_v8 = vpop.f32.mrf.mxu0  ;;  %v2416_v34 = vadd.f32 %v2409_v56, %v2249_v2 }
 0x2d3   :  { %v2411_v52 = vpop.f32.mrf.mxu1  ;;  %v2415_v15 = vadd.f32 %v2340_v8, %v2248_v17 }
 0x2d4   :  { %v2489_v1 = vpop.f32.mrf.mxu0  ;;  %v2417_v23 = vadd.f32 %v2411_v52, %v2250_v46 }
 0x2d5   :  { %v2565_v31 = vadd.f32 %v2489_v1, %v2414_v63 }
 0x2d6   :  { %v2491_v13 = vpop.f32.mrf.mxu0  ;;  %v2560_v33 = vpop.f32.mrf.mxu1 }
 0x2d7   :  { %v2566_v43 = vadd.f32 %v2491_v13, %v2415_v15  ;;  %v2567_v20 = vadd.f32 %v2560_v33, %v2416_v34 }
 0x2d8   :  { %v2656_v37 = vpop.f32.mrf.mxu0  ;;  %v2562_v58 = vpop.f32.mrf.mxu1 }
 0x2d9   :  { %v2732_v45 = vadd.f32 %v2656_v37, %v2565_v31  ;;  %v2568_v62 = vadd.f32 %v2562_v58, %v2417_v23 }
 0x2da   :  { %v2658_v24 = vpop.f32.mrf.mxu0  ;;  %v2727_v50 = vpop.f32.mrf.mxu1 }
 0x2db   :  { %v2733_v54 = vadd.f32 %v2658_v24, %v2566_v43  ;;  %v2734_v5 = vadd.f32 %v2727_v50, %v2567_v20 }
 0x2dc   :  { %v2729_v61 = vpop.f32.mrf.mxu1 }
 0x2dd   :  { %v2823_v26 = vpop.f32.mrf.mxu0  ;;  %v2735_v40 = vadd.f32 %v2729_v61, %v2568_v62 }
 0x2de   :  { %v2899_v57 = vadd.f32 %v2823_v26, %v2732_v45 }
 0x2df   :  { %v2825_v19 = vpop.f32.mrf.mxu0 }
 0x2e0   :  { %v2900_v35 = vadd.f32 %v2825_v19, %v2733_v54 }
 0x2e1   :  { %v2894_v4 = vpop.f32.mrf.mxu1 }
 0x2e2   :  { %v2901_v29 = vadd.f32 %v2894_v4, %v2734_v5 }
 0x2e3   :  { %v2896_v53 = vpop.f32.mrf.mxu1 }
 0x2e4   :  { %v2902_v48 = vadd.f32 %v2896_v53, %v2735_v40 }
 0x2e5   :  { %v2990_v22 = vpop.f32.mrf.mxu0 }
 0x2e6   :  { %v3066_v7 = vadd.f32 %v2990_v22, %v2899_v57 }
 0x2e7   :  { %v2992_v59 = vpop.f32.mrf.mxu0 }
 0x2e8   :  { %v3067_v16 = vadd.f32 %v2992_v59, %v2900_v35 }
 0x2e9   :  { %v3061_v0 = vpop.f32.mrf.mxu1 }
 0x2ea   :  { %v3068_v47 = vadd.f32 %v3061_v0, %v2901_v29 }
 0x2eb   :  { %v3063_v41 = vpop.f32.mrf.mxu1 }
 0x2ec   :  { %v3069_v36 = vadd.f32 %v3063_v41, %v2902_v48 }
 0x2ed   :  { %v3157_v6 = vpop.f32.mrf.mxu0 }
 0x2ee   :  { %v4220_v18 = vadd.f32 %v3157_v6, %v3066_v7 }
 0x2ef   :  { %v3159_v25 = vpop.f32.mrf.mxu0 }
 0x2f0   :  { %v4223_v42 = vmul.f32 0.70710677, %v4220_v18  ;;  %v4225_v44 = vadd.f32 %v3159_v25, %v3067_v16 }
 0x2f1   :  { %v3228_v3 = vpop.f32.mrf.mxu1 }
 0x2f2   :  { %v3245_v10 = vand.u32 2147483647, %v4223_v42  ;;  %v4229_v14 = vmul.f32 0.70710677, %v4225_v44  ;;  %v4231_v39 = vadd.f32 %v3228_v3, %v3068_v47  ;;  %vm3325_vm11 = vcmp.ge.f32.partialorder %v4223_v42, 0.0 }
 0x2f3   :  { %v3230_v38 = vpop.f32.mrf.mxu1 }
 0x2f4   :  { %v3249_v49 = vmul.f32 0.3275911, %v3245_v10  ;;  %v3246_v60 = vand.u32 2147483647, %v4229_v14  ;;  %v4235_v56 = vmul.f32 0.70710677, %v4231_v39  ;;  %v4237_v8 = vadd.f32 %v3230_v38, %v3069_v36 }
 0x2f5   :  { %v3301_v21 = vsub.f32 0.0, %v3245_v10  ;;  %vm3326_vm13 = vcmp.ge.f32.partialorder %v4229_v14, 0.0 }
 0x2f6   :  { %v3253_v52 = vadd.f32 1.0, %v3249_v49  ;;  %v3250_v1 = vmul.f32 0.3275911, %v3246_v60  ;;  %v3247_v13 = vand.u32 2147483647, %v4235_v56  ;;  %v3302_v9 = vsub.f32 0.0, %v3246_v60 }
 0x2f7   :  { %v4241_v33 = vmul.f32 0.70710677, %v4237_v8  ;;  %v3305_v26 = vmul.f32 %v3301_v21, %v3245_v10  ;;  %vm3327_vm0 = vcmp.ge.f32.partialorder %v4235_v56, 0.0 }
 0x2f8   :  { %3432 = vrcp.f32 %v3253_v52  ;;  %v3254_v37 = vadd.f32 1.0, %v3250_v1  ;;  %v3251_v58 = vmul.f32 0.3275911, %v3247_v13  ;;  %v3303_v32 = vsub.f32 0.0, %v3247_v13 }
 0x2f9   :  { %v3248_v55 = vand.u32 2147483647, %v4241_v33  ;;  %v3306_v27 = vmul.f32 %v3302_v9, %v3246_v60  ;;  %v3309_v17 = vmul.f32 1.442695, %v3305_v26  ;;  %vm3328_vm9 = vcmp.ge.f32.partialorder %v4241_v33, 0.0  ;;  %v3451_v33 = vld [vmem:[%s4268_s1 + $0x18] sm:$0xff] }
 0x2fa   :  { %3434 = vrcp.f32 %v3254_v37  ;;  %v3255_v24 = vadd.f32 1.0, %v3251_v58  ;;  %v3307_v12 = vmul.f32 %v3303_v32, %v3247_v13 }
 0x2fb   :  { %v3252_v11 = vmul.f32 0.3275911, %v3248_v55  ;;  %v3304_v63 = vsub.f32 0.0, %v3248_v55  ;;  %v3311_v15 = vmul.f32 1.442695, %v3306_v27 }
 0x2fc   :  { %3436 = vrcp.f32 %v3255_v24  ;;  %v3313_v45 = vmul.f32 1.442695, %v3307_v12 }
 0x2fd   :  { %v3256_v50 = vadd.f32 1.0, %v3252_v11  ;;  %v3308_v2 = vmul.f32 %v3304_v63, %v3248_v55 }
 0x2ff   :  { %3438 = vrcp.f32 %v3256_v50  ;;  %v3315_v20 = vmul.f32 1.442695, %v3308_v2 }
 0x300   :  { %3440 = vpow2.f32 %v3309_v17  ;;  %v3237_v17 = vmul.f32 0.5, %v4220_v18 }
 0x301   :  { %3442 = vpow2.f32 %v3311_v15 }
 0x302   :  { %3444 = vpow2.f32 %v3313_v45 }
 0x303   :  { %3446 = vpow2.f32 %v3315_v20 }
 0x305   :  { %v3433_v28 = vpop.eup %3432 }
 0x306   :  { %v3265_v61 = vmul.f32 1.0614054, %v3433_v28 }
 0x307   :  { %v3435_v30 = vpop.eup %3434 }
 0x308   :  { %v3269_v19 = vadd.f32 -1.4531521, %v3265_v61  ;;  %v3266_v4 = vmul.f32 1.0614054, %v3435_v30 }
 0x309   :  { %v3437_v31 = vpop.eup %3436 }
 0x30a   :  { %v3273_v51 = vmul.f32 %v3433_v28, %v3269_v19  ;;  %v3270_v22 = vadd.f32 -1.4531521, %v3266_v4  ;;  %v3267_v43 = vmul.f32 1.0614054, %v3437_v31 }
 0x30c   :  { %v3277_v46 = vadd.f32 1.4214138, %v3273_v51  ;;  %v3439_v34 = vpop.eup %3438  ;;  %v3274_v53 = vmul.f32 %v3435_v30, %v3270_v22  ;;  %v3271_v54 = vadd.f32 -1.4531521, %v3267_v43  ;;  %v3238_v51 = vmul.f32 0.5, %v4225_v44  ;;  %v3448_v22 = vld [vmem:[%s4268_s1] sm:$0xff] }
 0x30d   :  { %v3268_v23 = vmul.f32 1.0614054, %v3439_v34  ;;  %v3441_v36 = vpop.eup %3440  ;;  %v3449_v44 = vld [vmem:[%s4268_s1 + $0x8] sm:$0xff] }
 0x30e   :  { %v3281_v57 = vmul.f32 %v3433_v28, %v3277_v46  ;;  %v3278_v59 = vadd.f32 1.4214138, %v3274_v53  ;;  %v3275_v0 = vmul.f32 %v3437_v31, %v3271_v54  ;;  %v3443_v37 = vpop.eup %3442  ;;  %v3239_v46 = vmul.f32 0.5, %v4231_v39  ;;  %v3450_v39 = vld [vmem:[%s4268_s1 + $0x10] sm:$0xff] }
 0x30f   :  { %v3272_v7 = vadd.f32 -1.4531521, %v3268_v23  ;;  %v3445_v50 = vpop.eup %3444 }
 0x310   :  { %v3285_v35 = vadd.f32 -0.28449672, %v3281_v57  ;;  %v3282_v62 = vmul.f32 %v3435_v30, %v3278_v59  ;;  %v3279_v5 = vadd.f32 1.4214138, %v3275_v0  ;;  %v3447_v61 = vpop.eup %3446  ;;  %v3240_v57 = vmul.f32 0.5, %v4237_v8 }
 0x311   :  { %v3276_v16 = vmul.f32 %v3439_v34, %v3272_v7 }
 0x312   :  { %v3289_v6 = vmul.f32 %v3433_v28, %v3285_v35  ;;  %v3286_v40 = vadd.f32 -0.28449672, %v3282_v62  ;;  %v3283_v29 = vmul.f32 %v3437_v31, %v3279_v5 }
 0x313   :  { %v3280_v25 = vadd.f32 1.4214138, %v3276_v16 }
 0x314   :  { %v3293_v41 = vadd.f32 0.2548296, %v3289_v6  ;;  %v3290_v48 = vmul.f32 %v3435_v30, %v3286_v40  ;;  %v3287_v47 = vadd.f32 -0.28449672, %v3283_v29 }
 0x315   :  { %v3284_v10 = vmul.f32 %v3439_v34, %v3280_v25 }
 0x316   :  { %v3297_v3 = vmul.f32 %v3433_v28, %v3293_v41  ;;  %v3294_v38 = vadd.f32 0.2548296, %v3290_v48  ;;  %v3291_v49 = vmul.f32 %v3437_v31, %v3287_v47 }
 0x317   :  { %v3288_v52 = vadd.f32 -0.28449672, %v3284_v10 }
 0x318   :  { %v3317_v60 = vmul.f32 %v3441_v36, %v3297_v3  ;;  %v3298_v1 = vmul.f32 %v3435_v30, %v3294_v38  ;;  %v3295_v13 = vadd.f32 0.2548296, %v3291_v49 }
 0x319   :  { %v3292_v55 = vmul.f32 %v3439_v34, %v3288_v52 }
 0x31a   :  { %v3321_v58 = vsub.f32 1.0, %v3317_v60  ;;  %v3318_v24 = vmul.f32 %v3443_v37, %v3298_v1  ;;  %v3299_v11 = vmul.f32 %v3437_v31, %v3295_v13 }
 0x31b   :  { %v3296_v9 = vadd.f32 0.2548296, %v3292_v55 }
 0x31c   :  { %v3329_v21 = vsub.f32 0.0, %v3321_v58  ;;  %v3322_v26 = vsub.f32 1.0, %v3318_v24  ;;  %v3319_v32 = vmul.f32 %v3445_v50, %v3299_v11 }
 0x31d   :  { %v3300_v27 = vmul.f32 %v3439_v34, %v3296_v9 }
 0x31e   :  { %v3333_v28 = vsel %vm3325_vm11, %v3321_v58, %v3329_v21  ;;  %v3330_v12 = vsub.f32 0.0, %v3322_v26  ;;  %v3323_v30 = vsub.f32 1.0, %v3319_v32 }
 0x31f   :  { %v3337_v63 = vadd.f32 1.0, %v3333_v28  ;;  %v3320_v19 = vmul.f32 %v3447_v61, %v3300_v27 }
 0x320   :  { %v3334_v15 = vsel %vm3326_vm13, %v3322_v26, %v3330_v12  ;;  %v3331_v31 = vsub.f32 0.0, %v3323_v30 }
 0x321   :  { %v3341_v4 = vmul.f32 %v3337_v63, %v3237_v17  ;;  %v3338_v2 = vadd.f32 1.0, %v3334_v15  ;;  %v3324_v42 = vsub.f32 1.0, %v3320_v19 }
 0x322   :  { %v3335_v43 = vsel %vm3327_vm0, %v3323_v30, %v3331_v31 }
 0x323   :  { %v3345_v18 = vadd.f32 %v3448_v22, %v3341_v4  ;;  %v3342_v45 = vmul.f32 %v3338_v2, %v3238_v51  ;;  %v3339_v14 = vadd.f32 1.0, %v3335_v43  ;;  %v3332_v34 = vsub.f32 0.0, %v3324_v42 }
 0x325   :  { %3349 = vst [vmem:[#allocation2] sm:$0xff] %v3345_v18  ;;  %v3346_v56 = vadd.f32 %v3449_v44, %v3342_v45  ;;  %v3343_v53 = vmul.f32 %v3339_v14, %v3239_v46  ;;  %v3336_v54 = vsel %vm3328_vm9, %v3324_v42, %v3332_v34 }
 0x326   :  { %v3340_v23 = vadd.f32 1.0, %v3336_v54 }
 0x327   :  { %3350 = vst [vmem:[#allocation2 + $0x8] sm:$0xff] %v3346_v56  ;;  %v3347_v20 = vadd.f32 %v3450_v39, %v3343_v53 }
 0x328   :  { %v3344_v59 = vmul.f32 %v3340_v23, %v3240_v57 }
 0x329   :  { %3351 = vst [vmem:[#allocation2 + $0x10] sm:$0xff] %v3347_v20 }
 0x32a   :  { %v3348_v0 = vadd.f32 %v3451_v33, %v3344_v59 }
 0x32c   :  { %3352 = vst [vmem:[#allocation2 + $0x18] sm:$0xff] %v3348_v0 }
 0x32d   :  { %3463 = shalt.err (!%p3460_p4)
}
 0x32e   :  { %3362 = dma.vmem_to_hbm [thread:$0]  %s3360_s17, 512, %s4273_s6, [#allocation3]  }
 0x32f   :  { %3472 = dma.done.wait [#allocation3], 512  }
 0x330   :  { %3473 = vsyncadd [#allocation3], 4294966784 }
 0x331   :  { %3366 = vsyncpa [#allocation3], 1 }

</bundles_post_ra>
